<compile_context>
chip_gen: v7x
topology: tpu7x:2x2x1
jax: 0.10.0
libtpu: 0.0.40
codegen_flags: <defaults>
</compile_context>

<pallas_src>
import functools
import math

import jax
import jax.numpy as jnp
from jax.experimental import pallas as pl
from jax.experimental.pallas import tpu as pltpu


# ----------------------------------------------------------------------------
# Kernel 1: fused conv1d+PE seed  +  num_layers TransformerEncoderLayers
# ----------------------------------------------------------------------------
def fused_stack_kernel(xs_ref, kpb_ref, convw_ref, peb_ref,
                       wqkv_ref, wo_ref, w1_ref, w2_ref, small_ref, b1_ref,
                       out_ref, h_ref, *, nhead):
    # grid = (batch_blocks, num_layers); layer axis innermost ("arbitrary").
    #   xs_ref:   (BB, L, K*H) f32  shifted+concatenated hidden states
    #   kpb_ref:  (BB, 1, L)   f32  additive key-padding bias (0 / -1e9)
    #   convw_ref:(K*H, C)     bf16 conv folded to one matmul (contraction K*H)
    #   peb_ref:  (L, C)       f32  positional encoding + conv bias
    #   wqkv_ref: (1, C, 3C)   bf16 fused [Wq|Wk|Wv]     wo_ref: (1, C, C) bf16
    #   w1_ref:   (1, C, FF)   bf16 FFN up               w2_ref: (1, FF, C) bf16
    #   small_ref:(1, 9, C)    f32  rows: bq,bk,bv,bo,ln1g,ln1b,b2,ln2g,ln2b
    #   b1_ref:   (1, 1, FF)   f32
    #   out_ref:  (BB, L, C)   bf16 (bf16 hand-off to fc_out)
    #   h_ref:    (BB*L, C)    f32 VMEM residual-stream carry across layers
    layer = pl.program_id(1)
    BB, L, C = out_ref.shape
    N = BB * L
    d = C // nhead
    scale = 1.0 / math.sqrt(d)

    # ---- layer 0: conv1d (single K*H-contraction matmul) + PE seed ----
    @pl.when(layer == 0)
    def _():
        KH = xs_ref.shape[2]
        xs = xs_ref[...].reshape(N, KH).astype(jnp.bfloat16)
        h0 = jnp.dot(xs, convw_ref[...], preferred_element_type=jnp.float32)
        h0 = h0.reshape(BB, L, C) + peb_ref[...][None, :, :]
        h_ref[...] = h0.reshape(N, C)

    x = h_ref[...]                                    # (N, C) f32 residual stream
    x_bf = x.astype(jnp.bfloat16)

    sm = small_ref[0]                                 # (9, C) f32
    bq, bk, bv = sm[0:1, :], sm[1:2, :], sm[2:3, :]
    bo = sm[3:4, :]
    ln1g, ln1b = sm[4:5, :], sm[5:6, :]
    b2 = sm[6:7, :]
    ln2g, ln2b = sm[7:8, :], sm[8:9, :]

    # ---- self-attention: one fused QKV matmul, per-sample scores ----
    qkv = jnp.dot(x_bf, wqkv_ref[0], preferred_element_type=jnp.float32)  # (N, 3C)
    q3 = (qkv[:, :C] + bq).reshape(BB, L, C)
    k3 = (qkv[:, C:2 * C] + bk).reshape(BB, L, C)
    v3 = (qkv[:, 2 * C:] + bv).reshape(BB, L, C)
    kp = kpb_ref[...]                                 # (BB, 1, L) f32 mask bias

    # Heads unrolled statically; each head is a sample-batched (L,L) score /
    # softmax / PV.  Fully-masked key rows give a uniform softmax here
    # (PyTorch would produce NaN) — benign divergence.
    o_parts = []
    for h in range(nhead):
        lo, hi = h * d, (h + 1) * d
        qh = q3[:, :, lo:hi].astype(jnp.bfloat16)
        kh = k3[:, :, lo:hi].astype(jnp.bfloat16)
        vh = v3[:, :, lo:hi].astype(jnp.bfloat16)
        s = jnp.einsum('bqd,bkd->bqk', qh, kh,
                       preferred_element_type=jnp.float32) * scale
        s = s + kp                                    # mask add kept in f32
        m = jnp.max(s, axis=-1, keepdims=True)
        p = jnp.exp(s - m)
        p = p * pl.reciprocal(jnp.sum(p, axis=-1, keepdims=True), approx=True)
        o_parts.append(jnp.einsum('bqk,bkd->bqd', p.astype(jnp.bfloat16), vh,
                                  preferred_element_type=jnp.float32))
    o2 = jnp.concatenate(o_parts, axis=-1).reshape(N, C)       # head-major (N, C)
    attn = jnp.dot(o2.astype(jnp.bfloat16), wo_ref[0],
                   preferred_element_type=jnp.float32) + bo    # single (C,C) proj

    def layer_norm(z, g, b):
        mu = jnp.mean(z, axis=-1, keepdims=True)
        var = jnp.mean((z - mu) ** 2, axis=-1, keepdims=True)
        return (z - mu) * jax.lax.rsqrt(var + 1e-5) * g + b

    y = layer_norm(x + attn, ln1g, ln1b)

    # ---- feed-forward (ReLU) ----
    ff = jnp.dot(y.astype(jnp.bfloat16), w1_ref[0],
                 preferred_element_type=jnp.float32) + b1_ref[0]
    ff = jnp.maximum(ff, 0.0)
    ff = jnp.dot(ff.astype(jnp.bfloat16), w2_ref[0],
                 preferred_element_type=jnp.float32) + b2
    z = layer_norm(y + ff, ln2g, ln2b)

    h_ref[...] = z                                    # carry to next layer

    @pl.when(layer == pl.num_programs(1) - 1)
    def _():
        out_ref[...] = z.reshape(BB, L, C).astype(out_ref.dtype)


# ----------------------------------------------------------------------------
# Kernel 2: output projection (fc_out)
# ----------------------------------------------------------------------------
def fc_kernel(x_ref, w_ref, b_ref, out_ref):
    # x_ref: (R, C) bf16   w_ref: (C, V) bf16   b_ref: (1, V) f32   out: (R, V) f32
    y = jnp.dot(x_ref[...], w_ref[...], preferred_element_type=jnp.float32)
    out_ref[...] = (y + b_ref[...]).astype(out_ref.dtype)


# ----------------------------------------------------------------------------
# Wrappers
# ----------------------------------------------------------------------------
def run_fused_stack(x_shift, kpb, conv_w, peb, stack, *, nhead, batch_block):
    B, L, KH = x_shift.shape
    C = conv_w.shape[1]
    FF = stack["w1"].shape[2]
    NL = stack["wqkv"].shape[0]
    assert B % batch_block == 0
    nb = B // batch_block
    N = batch_block * L

    kernel = functools.partial(fused_stack_kernel, nhead=nhead)
    return pl.pallas_call(
        kernel,
        out_shape=jax.ShapeDtypeStruct((B, L, C), jnp.bfloat16),
        grid=(nb, NL),
        in_specs=[
            pl.BlockSpec((batch_block, L, KH), lambda b, l: (b, 0, 0)),
            pl.BlockSpec((batch_block, 1, L), lambda b, l: (b, 0, 0)),
            pl.BlockSpec((KH, C), lambda b, l: (0, 0)),
            pl.BlockSpec((L, C), lambda b, l: (0, 0)),
            pl.BlockSpec((1, C, 3 * C), lambda b, l: (l, 0, 0)),
            pl.BlockSpec((1, C, C), lambda b, l: (l, 0, 0)),
            pl.BlockSpec((1, C, FF), lambda b, l: (l, 0, 0)),
            pl.BlockSpec((1, FF, C), lambda b, l: (l, 0, 0)),
            pl.BlockSpec((1, 9, C), lambda b, l: (l, 0, 0)),
            pl.BlockSpec((1, 1, FF), lambda b, l: (l, 0, 0)),
        ],
        out_specs=pl.BlockSpec((batch_block, L, C), lambda b, l: (b, 0, 0)),
        scratch_shapes=[pltpu.VMEM((N, C), jnp.float32)],
        compiler_params=pltpu.CompilerParams(
            dimension_semantics=("parallel", "arbitrary"),
            # At BERT-ish C/FF, re-audit against 64 MiB (v7x) / 16 MiB (v5e
            # scoped default): double-buffered per-layer weights + (N,C) carry.
            vmem_limit_bytes=32 * 1024 * 1024),
    )(x_shift, kpb, conv_w, peb,
      stack["wqkv"], stack["wo"], stack["w1"], stack["w2"],
      stack["small"], stack["b1"])


def run_fc(x_bf, w, b, *, row_block):
    # Vocab kept as a single full-extent block: exact FLOPs, no 512-pad, no
    # host-side logits slice.  At deployment vocab sizes, add a vocab-tile
    # grid axis with the weight padded to the tile multiple instead.
    B, L, C = x_bf.shape
    V = w.shape[1]
    rows = B * L
    x2 = x_bf.reshape(rows, C)
    out = pl.pallas_call(
        fc_kernel,
        out_shape=jax.ShapeDtypeStruct((rows, V), jnp.float32),
        grid=(rows // row_block,),
        in_specs=[
            pl.BlockSpec((row_block, C), lambda i: (i, 0)),
            pl.BlockSpec((C, V), lambda i: (0, 0)),
            pl.BlockSpec((1, V), lambda i: (0, 0)),
        ],
        out_specs=pl.BlockSpec((row_block, V), lambda i: (i, 0)),
        compiler_params=pltpu.CompilerParams(
            dimension_semantics=("parallel",),
            vmem_limit_bytes=32 * 1024 * 1024),
    )(x2, w, b)
    return out.reshape(B, L, V)


# ----------------------------------------------------------------------------
# Host-side glue
# ----------------------------------------------------------------------------
def positional_encoding(max_len, d_model):
    position = jnp.arange(max_len, dtype=jnp.float32)[:, None]
    div_term = jnp.exp(jnp.arange(0, d_model, 2, dtype=jnp.float32)
                       * (-math.log(10000.0) / d_model))
    pe = jnp.zeros((max_len, d_model), jnp.float32)
    pe = pe.at[:, 0::2].set(jnp.sin(position * div_term))
    pe = pe.at[:, 1::2].set(jnp.cos(position * div_term))
    return pe


def build_shifted_hidden(hidden, kernel_size):
    # Conv1d(same pad) as one matmul: out[l] = sum_k x[l + k - pad] @ W[k], so
    # concat the K zero-padded shifts of x along features -> (B, L, K*H).
    B, L, H = hidden.shape
    pad = (kernel_size - 1) // 2
    taps = []
    for k in range(kernel_size):
        shift = k - pad
        z = jnp.zeros_like(hidden)
        if shift == 0:
            taps.append(hidden)
        elif shift > 0:
            taps.append(z.at[:, :L - shift, :].set(hidden[:, shift:, :]))
        else:
            taps.append(z.at[:, -shift:, :].set(hidden[:, :L + shift, :]))
    return jnp.concatenate(taps, axis=-1)


def _default_batch_block(batch):
    # Expose >= 2 blocks on the 'parallel' batch axis (v7x has 2 TensorCores);
    # harmless on single-core v5e / v6e.
    if batch <= 1:
        return batch
    for cand in range(batch // 2, 0, -1):
        if batch % cand == 0:
            return cand
    return 1


def init_params(key, *, vocab_size, hidden, cnn_channels, kernel_size,
                nhead, dim_feedforward, num_layers):
    C, FF, H, NL, K = cnn_channels, dim_feedforward, hidden, num_layers, kernel_size
    std = 0.02
    ks = jax.random.split(key, 8)
    p = {"vocab_size": vocab_size, "kernel_size": K}

    # TODO(synk): the pretrained BioBERT encoder is not reproducible in-script;
    # replaced by an embedding-lookup stand-in producing last_hidden_state.
    p["emb"] = std * jax.random.normal(ks[0], (vocab_size, H), jnp.float32)

    # Conv1d(H -> C, k): torch weight (C, H, K) folded to a (K*H, C) matmul.
    conv_w = std * jax.random.normal(ks[1], (C, H, K), jnp.float32)
    p["conv_w"] = (jnp.transpose(conv_w, (2, 1, 0))
                   .reshape(K * H, C).astype(jnp.bfloat16))
    p["conv_b"] = jnp.zeros((1, C), jnp.float32)

    # fc_out: pre-transposed (C, V) bf16, exact vocab width.
    fc_w = std * jax.random.normal(ks[2], (vocab_size, C), jnp.float32)
    p["fc_w"] = fc_w.T.astype(jnp.bfloat16)
    p["fc_b"] = jnp.zeros((1, vocab_size), jnp.float32)

    def nrm(k_, shape):
        return (std * jax.random.normal(k_, shape, jnp.float32)).astype(jnp.bfloat16)

    lk = jax.random.split(ks[3], 4)
    small = jnp.zeros((NL, 9, C), jnp.float32)
    small = small.at[:, 4, :].set(1.0)      # ln1 gamma
    small = small.at[:, 7, :].set(1.0)      # ln2 gamma
    p["stack"] = {
        "wqkv": nrm(lk[0], (NL, C, 3 * C)),   # fused [Wq | Wk | Wv], head-major cols
        "wo":   nrm(lk[1], (NL, C, C)),
        "w1":   nrm(lk[2], (NL, C, FF)),
        "w2":   nrm(lk[3], (NL, FF, C)),
        "small": small,                       # rows: bq,bk,bv,bo,ln1g,ln1b,b2,ln2g,ln2b
        "b1":   jnp.zeros((NL, 1, FF), jnp.float32),
    }
    return p


def forward(params, input_ids, attention_mask, *, nhead, batch_block=None):
    B, L = input_ids.shape
    C = params["conv_w"].shape[1]
    K = params["kernel_size"]
    if batch_block is None:
        batch_block = _default_batch_block(B)

    # 1) BioBERT stand-in (plain JAX glue): last_hidden_state (B, L, hidden)
    hidden = params["emb"][input_ids]
    # 2) conv taps unfolded on host -> single K*H-contraction matmul in-kernel
    x_shift = build_shifted_hidden(hidden, K)                    # (B, L, K*H)
    peb = positional_encoding(L, C) + params["conv_b"]           # (L, C)
    # per-sample additive key-padding bias (dropout = identity at inference)
    kpb = jnp.where(attention_mask != 0, 0.0, -1e9).astype(jnp.float32)[:, None, :]

    # 3) fused conv + PE + transformer encoder stack
    enc = run_fused_stack(x_shift, kpb, params["conv_w"], peb, params["stack"],
                          nhead=nhead, batch_block=batch_block)  # (B, L, C) bf16
    # 4) output projection
    return run_fc(enc, params["fc_w"], params["fc_b"], row_block=batch_block * L)


if __name__ == "__main__":
    # Small shapes consistent with the module's forward.
    B, L = 2, 8                 # batch, sequence length
    HIDDEN = 32                 # stand-in BioBERT hidden size
    NHEAD = 8
    CNN_CHANNELS = 32           # already divisible by nhead
    KERNEL_SIZE = 3             # num_filters
    NUM_LAYERS = 2
    DIM_FF = 64
    VOCAB = 48

    key = jax.random.PRNGKey(0)
    k_param, k_ids = jax.random.split(key)
    params = init_params(k_param, vocab_size=VOCAB, hidden=HIDDEN,
                         cnn_channels=CNN_CHANNELS, kernel_size=KERNEL_SIZE,
                         nhead=NHEAD, dim_feedforward=DIM_FF,
                         num_layers=NUM_LAYERS)

    input_ids = jax.random.randint(k_ids, (B, L), 0, VOCAB, dtype=jnp.int32)
    attention_mask = jnp.ones((B, L), jnp.int32).at[1, 6:].set(0)  # pad tail

    out = forward(params, input_ids, attention_mask, nhead=NHEAD)
    out = jax.block_until_ready(out)
    assert out.shape == (B, L, VOCAB)
    assert bool(jnp.all(jnp.isfinite(out)))
    print("KERNEL_OK")
</pallas_src>

<mosaic_0001>
module attributes {stable_mosaic.version = 11 : i64} {
  func.func @fused_stack_kernel(%arg0: i32, %arg1: i32, %arg2: memref<1x8x96xf32, #tpu.memory_space<vmem>>, %arg3: memref<1x1x8xf32, #tpu.memory_space<vmem>>, %arg4: memref<96x32xbf16, #tpu.memory_space<vmem>>, %arg5: memref<8x32xf32, #tpu.memory_space<vmem>>, %arg6: memref<1x32x96xbf16, #tpu.memory_space<vmem>>, %arg7: memref<1x32x32xbf16, #tpu.memory_space<vmem>>, %arg8: memref<1x32x64xbf16, #tpu.memory_space<vmem>>, %arg9: memref<1x64x32xbf16, #tpu.memory_space<vmem>>, %arg10: memref<1x9x32xf32, #tpu.memory_space<vmem>>, %arg11: memref<1x1x64xf32, #tpu.memory_space<vmem>>, %arg12: memref<1x8x32xbf16, #tpu.memory_space<vmem>>, %arg13: memref<8x32xf32, #tpu.memory_space<vmem>>) attributes {dimension_semantics = [#tpu.dimension_semantics<parallel>, #tpu.dimension_semantics<arbitrary>], iteration_bounds = array<i64: 2, 2>, scalar_prefetch = 0 : i64, scratch_operands = 1 : i64, tpu.core_type = #tpu.core_type<tc>, window_params = [{transform_indices = @transform_0, window_bounds = array<i64: 1, 8, 96>}, {transform_indices = @transform_1, window_bounds = array<i64: 1, 1, 8>}, {pipeline_mode = #tpu.pipeline_mode<synchronous>, transform_indices = @transform_2, window_bounds = array<i64: 96, 32>}, {pipeline_mode = #tpu.pipeline_mode<synchronous>, transform_indices = @transform_3, window_bounds = array<i64: 8, 32>}, {transform_indices = @transform_4, window_bounds = array<i64: 1, 32, 96>}, {transform_indices = @transform_5, window_bounds = array<i64: 1, 32, 32>}, {transform_indices = @transform_6, window_bounds = array<i64: 1, 32, 64>}, {transform_indices = @transform_7, window_bounds = array<i64: 1, 64, 32>}, {transform_indices = @transform_8, window_bounds = array<i64: 1, 9, 32>}, {transform_indices = @transform_9, window_bounds = array<i64: 1, 1, 64>}, {transform_indices = @transform_10, window_bounds = array<i64: 1, 8, 32>}]} {
    %c0_i32 = arith.constant 0 : i32
    %0 = arith.cmpi eq, %arg1, %c0_i32 : i32
    %1 = arith.extui %0 : i1 to i32
    %c0_i32_0 = arith.constant 0 : i32
    %2 = arith.cmpi ne, %1, %c0_i32_0 : i32
    scf.if %2 {
      %c0_80 = arith.constant 0 : index
      %c0_81 = arith.constant 0 : index
      %c0_82 = arith.constant 0 : index
      %290 = vector.load %arg2[%c0_80, %c0_81, %c0_82] : memref<1x8x96xf32, #tpu.memory_space<vmem>>, vector<1x8x96xf32>
      %291 = vector.shape_cast %290 : vector<1x8x96xf32> to vector<8x96xf32>
      %292 = arith.truncf %291 : vector<8x96xf32> to vector<8x96xbf16>
      %c0_83 = arith.constant 0 : index
      %c0_84 = arith.constant 0 : index
      %293 = vector.load %arg4[%c0_83, %c0_84] : memref<96x32xbf16, #tpu.memory_space<vmem>>, vector<96x32xbf16>
      %cst_85 = arith.constant dense<0.000000e+00> : vector<8x32xf32>
      %294 = tpu.matmul %292, %293, %cst_85 {dimension_numbers = #tpu.dot_dimension_numbers<[1], [0], [0], [1], [0, 0, 1, 1], [], []>} : vector<8x96xbf16>, vector<96x32xbf16>, vector<8x32xf32> -> vector<8x32xf32>
      %295 = vector.shape_cast %294 : vector<8x32xf32> to vector<1x8x32xf32>
      %c0_86 = arith.constant 0 : index
      %c0_87 = arith.constant 0 : index
      %296 = vector.load %arg5[%c0_86, %c0_87] : memref<8x32xf32, #tpu.memory_space<vmem>>, vector<8x32xf32>
      %297 = vector.shape_cast %296 : vector<8x32xf32> to vector<1x8x32xf32>
      %298 = arith.addf %295, %297 : vector<1x8x32xf32>
      %299 = vector.shape_cast %298 : vector<1x8x32xf32> to vector<8x32xf32>
      %c0_88 = arith.constant 0 : index
      %c0_89 = arith.constant 0 : index
      %300 = vector.load %arg13[%c0_88, %c0_89] : memref<8x32xf32, #tpu.memory_space<vmem>>, vector<8x32xf32>
      tpu.vector_store %arg13[%c0_88, %c0_89], %299 {strides = array<i32>} : memref<8x32xf32, #tpu.memory_space<vmem>>, vector<8x32xf32>,
    } else {
    }
    %c0 = arith.constant 0 : index
    %c0_1 = arith.constant 0 : index
    %3 = vector.load %arg13[%c0, %c0_1] : memref<8x32xf32, #tpu.memory_space<vmem>>, vector<8x32xf32>
    %4 = arith.truncf %3 : vector<8x32xf32> to vector<8x32xbf16>
    %c0_2 = arith.constant 0 : index
    %c0_3 = arith.constant 0 : index
    %c0_4 = arith.constant 0 : index
    %5 = vector.load %arg10[%c0_2, %c0_3, %c0_4] : memref<1x9x32xf32, #tpu.memory_space<vmem>>, vector<1x9x32xf32>
    %6 = vector.shape_cast %5 : vector<1x9x32xf32> to vector<9x32xf32>
    %7 = vector.extract_strided_slice %6 {offsets = [0, 0], sizes = [1, 32], strides = [1, 1]} : vector<9x32xf32> to vector<1x32xf32>
    %8 = vector.extract_strided_slice %6 {offsets = [1, 0], sizes = [1, 32], strides = [1, 1]} : vector<9x32xf32> to vector<1x32xf32>
    %9 = vector.extract_strided_slice %6 {offsets = [2, 0], sizes = [1, 32], strides = [1, 1]} : vector<9x32xf32> to vector<1x32xf32>
    %10 = vector.extract_strided_slice %6 {offsets = [3, 0], sizes = [1, 32], strides = [1, 1]} : vector<9x32xf32> to vector<1x32xf32>
    %11 = vector.extract_strided_slice %6 {offsets = [4, 0], sizes = [1, 32], strides = [1, 1]} : vector<9x32xf32> to vector<1x32xf32>
    %12 = vector.extract_strided_slice %6 {offsets = [5, 0], sizes = [1, 32], strides = [1, 1]} : vector<9x32xf32> to vector<1x32xf32>
    %13 = vector.extract_strided_slice %6 {offsets = [6, 0], sizes = [1, 32], strides = [1, 1]} : vector<9x32xf32> to vector<1x32xf32>
    %14 = vector.extract_strided_slice %6 {offsets = [7, 0], sizes = [1, 32], strides = [1, 1]} : vector<9x32xf32> to vector<1x32xf32>
    %15 = vector.extract_strided_slice %6 {offsets = [8, 0], sizes = [1, 32], strides = [1, 1]} : vector<9x32xf32> to vector<1x32xf32>
    %c0_5 = arith.constant 0 : index
    %c0_6 = arith.constant 0 : index
    %c0_7 = arith.constant 0 : index
    %16 = vector.load %arg6[%c0_5, %c0_6, %c0_7] : memref<1x32x96xbf16, #tpu.memory_space<vmem>>, vector<1x32x96xbf16>
    %17 = vector.shape_cast %16 : vector<1x32x96xbf16> to vector<32x96xbf16>
    %cst = arith.constant dense<0.000000e+00> : vector<8x96xf32>
    %18 = tpu.matmul %4, %17, %cst {dimension_numbers = #tpu.dot_dimension_numbers<[1], [0], [0], [1], [0, 0, 1, 1], [], []>} : vector<8x32xbf16>, vector<32x96xbf16>, vector<8x96xf32> -> vector<8x96xf32>
    %19 = vector.extract_strided_slice %18 {offsets = [0, 0], sizes = [8, 32], strides = [1, 1]} : vector<8x96xf32> to vector<8x32xf32>
    %20 = vector.broadcast %7 : vector<1x32xf32> to vector<8x32xf32>
    %21 = arith.addf %19, %20 : vector<8x32xf32>
    %22 = vector.shape_cast %21 : vector<8x32xf32> to vector<1x8x32xf32>
    %23 = vector.extract_strided_slice %18 {offsets = [0, 32], sizes = [8, 32], strides = [1, 1]} : vector<8x96xf32> to vector<8x32xf32>
    %24 = vector.broadcast %8 : vector<1x32xf32> to vector<8x32xf32>
    %25 = arith.addf %23, %24 : vector<8x32xf32>
    %26 = vector.shape_cast %25 : vector<8x32xf32> to vector<1x8x32xf32>
    %27 = vector.extract_strided_slice %18 {offsets = [0, 64], sizes = [8, 32], strides = [1, 1]} : vector<8x96xf32> to vector<8x32xf32>
    %28 = vector.broadcast %9 : vector<1x32xf32> to vector<8x32xf32>
    %29 = arith.addf %27, %28 : vector<8x32xf32>
    %30 = vector.shape_cast %29 : vector<8x32xf32> to vector<1x8x32xf32>
    %c0_8 = arith.constant 0 : index
    %c0_9 = arith.constant 0 : index
    %c0_10 = arith.constant 0 : index
    %31 = vector.load %arg3[%c0_8, %c0_9, %c0_10] : memref<1x1x8xf32, #tpu.memory_space<vmem>>, vector<1x1x8xf32>
    %32 = vector.extract_strided_slice %22 {offsets = [0, 0, 0], sizes = [1, 8, 4], strides = [1, 1, 1]} : vector<1x8x32xf32> to vector<1x8x4xf32>
    %33 = arith.truncf %32 : vector<1x8x4xf32> to vector<1x8x4xbf16>
    %34 = vector.extract_strided_slice %26 {offsets = [0, 0, 0], sizes = [1, 8, 4], strides = [1, 1, 1]} : vector<1x8x32xf32> to vector<1x8x4xf32>
    %35 = arith.truncf %34 : vector<1x8x4xf32> to vector<1x8x4xbf16>
    %36 = vector.extract_strided_slice %30 {offsets = [0, 0, 0], sizes = [1, 8, 4], strides = [1, 1, 1]} : vector<1x8x32xf32> to vector<1x8x4xf32>
    %37 = arith.truncf %36 : vector<1x8x4xf32> to vector<1x8x4xbf16>
    "tpu.trace_start"() <{level = 10 : i32, message = "bqd,bkd->bqk"}> : () -> ()
    %cst_11 = arith.constant dense<0.000000e+00> : vector<1x8x8xf32>
    %38 = tpu.matmul %33, %35, %cst_11 {dimension_numbers = #tpu.dot_dimension_numbers<[2], [2], [1], [1], [0, 0, 0, 1, 1, 1], [0], [0]>} : vector<1x8x4xbf16>, vector<1x8x4xbf16>, vector<1x8x8xf32> -> vector<1x8x8xf32>
    "tpu.trace_stop"() : () -> ()
    %cst_12 = arith.constant 5.000000e-01 : f32
    %39 = vector.broadcast %cst_12 : f32 to vector<1x8x8xf32>
    %40 = arith.mulf %38, %39 : vector<1x8x8xf32>
    %41 = vector.broadcast %31 : vector<1x1x8xf32> to vector<1x8x8xf32>
    %42 = arith.addf %40, %41 : vector<1x8x8xf32>
    %cst_13 = arith.constant dense<0xFF800000> : vector<1x8xf32>
    %43 = vector.multi_reduction <maximumf>, %42, %cst_13 [2] : vector<1x8x8xf32> to vector<1x8xf32>
    %44 = vector.shape_cast %43 : vector<1x8xf32> to vector<1x8x1xf32>
    %45 = vector.broadcast %44 : vector<1x8x1xf32> to vector<1x8x8xf32>
    %46 = arith.subf %42, %45 : vector<1x8x8xf32>
    %47 = math.exp %46 : vector<1x8x8xf32>
    %cst_14 = arith.constant dense<0.000000e+00> : vector<1x8xf32>
    %48 = vector.multi_reduction <add>, %47, %cst_14 [2] : vector<1x8x8xf32> to vector<1x8xf32>
    %49 = vector.shape_cast %48 : vector<1x8xf32> to vector<1x8x1xf32>
    %50 = tpu.reciprocal %49 {approx = true} : vector<1x8x1xf32> -> vector<1x8x1xf32>
    %51 = vector.broadcast %50 : vector<1x8x1xf32> to vector<1x8x8xf32>
    %52 = arith.mulf %47, %51 : vector<1x8x8xf32>
    %53 = arith.truncf %52 : vector<1x8x8xf32> to vector<1x8x8xbf16>
    "tpu.trace_start"() <{level = 10 : i32, message = "bqk,bkd->bqd"}> : () -> ()
    %cst_15 = arith.constant dense<0.000000e+00> : vector<1x8x4xf32>
    %54 = tpu.matmul %53, %37, %cst_15 {dimension_numbers = #tpu.dot_dimension_numbers<[2], [1], [1], [2], [0, 0, 0, 1, 1, 2], [0], [0]>} : vector<1x8x8xbf16>, vector<1x8x4xbf16>, vector<1x8x4xf32> -> vector<1x8x4xf32>
    "tpu.trace_stop"() : () -> ()
    %55 = vector.extract_strided_slice %22 {offsets = [0, 0, 4], sizes = [1, 8, 4], strides = [1, 1, 1]} : vector<1x8x32xf32> to vector<1x8x4xf32>
    %56 = arith.truncf %55 : vector<1x8x4xf32> to vector<1x8x4xbf16>
    %57 = vector.extract_strided_slice %26 {offsets = [0, 0, 4], sizes = [1, 8, 4], strides = [1, 1, 1]} : vector<1x8x32xf32> to vector<1x8x4xf32>
    %58 = arith.truncf %57 : vector<1x8x4xf32> to vector<1x8x4xbf16>
    %59 = vector.extract_strided_slice %30 {offsets = [0, 0, 4], sizes = [1, 8, 4], strides = [1, 1, 1]} : vector<1x8x32xf32> to vector<1x8x4xf32>
    %60 = arith.truncf %59 : vector<1x8x4xf32> to vector<1x8x4xbf16>
    "tpu.trace_start"() <{level = 10 : i32, message = "bqd,bkd->bqk"}> : () -> ()
    %cst_16 = arith.constant dense<0.000000e+00> : vector<1x8x8xf32>
    %61 = tpu.matmul %56, %58, %cst_16 {dimension_numbers = #tpu.dot_dimension_numbers<[2], [2], [1], [1], [0, 0, 0, 1, 1, 1], [0], [0]>} : vector<1x8x4xbf16>, vector<1x8x4xbf16>, vector<1x8x8xf32> -> vector<1x8x8xf32>
    "tpu.trace_stop"() : () -> ()
    %cst_17 = arith.constant 5.000000e-01 : f32
    %62 = vector.broadcast %cst_17 : f32 to vector<1x8x8xf32>
    %63 = arith.mulf %61, %62 : vector<1x8x8xf32>
    %64 = vector.broadcast %31 : vector<1x1x8xf32> to vector<1x8x8xf32>
    %65 = arith.addf %63, %64 : vector<1x8x8xf32>
    %cst_18 = arith.constant dense<0xFF800000> : vector<1x8xf32>
    %66 = vector.multi_reduction <maximumf>, %65, %cst_18 [2] : vector<1x8x8xf32> to vector<1x8xf32>
    %67 = vector.shape_cast %66 : vector<1x8xf32> to vector<1x8x1xf32>
    %68 = vector.broadcast %67 : vector<1x8x1xf32> to vector<1x8x8xf32>
    %69 = arith.subf %65, %68 : vector<1x8x8xf32>
    %70 = math.exp %69 : vector<1x8x8xf32>
    %cst_19 = arith.constant dense<0.000000e+00> : vector<1x8xf32>
    %71 = vector.multi_reduction <add>, %70, %cst_19 [2] : vector<1x8x8xf32> to vector<1x8xf32>
    %72 = vector.shape_cast %71 : vector<1x8xf32> to vector<1x8x1xf32>
    %73 = tpu.reciprocal %72 {approx = true} : vector<1x8x1xf32> -> vector<1x8x1xf32>
    %74 = vector.broadcast %73 : vector<1x8x1xf32> to vector<1x8x8xf32>
    %75 = arith.mulf %70, %74 : vector<1x8x8xf32>
    %76 = arith.truncf %75 : vector<1x8x8xf32> to vector<1x8x8xbf16>
    "tpu.trace_start"() <{level = 10 : i32, message = "bqk,bkd->bqd"}> : () -> ()
    %cst_20 = arith.constant dense<0.000000e+00> : vector<1x8x4xf32>
    %77 = tpu.matmul %76, %60, %cst_20 {dimension_numbers = #tpu.dot_dimension_numbers<[2], [1], [1], [2], [0, 0, 0, 1, 1, 2], [0], [0]>} : vector<1x8x8xbf16>, vector<1x8x4xbf16>, vector<1x8x4xf32> -> vector<1x8x4xf32>
    "tpu.trace_stop"() : () -> ()
    %78 = vector.extract_strided_slice %22 {offsets = [0, 0, 8], sizes = [1, 8, 4], strides = [1, 1, 1]} : vector<1x8x32xf32> to vector<1x8x4xf32>
    %79 = arith.truncf %78 : vector<1x8x4xf32> to vector<1x8x4xbf16>
    %80 = vector.extract_strided_slice %26 {offsets = [0, 0, 8], sizes = [1, 8, 4], strides = [1, 1, 1]} : vector<1x8x32xf32> to vector<1x8x4xf32>
    %81 = arith.truncf %80 : vector<1x8x4xf32> to vector<1x8x4xbf16>
    %82 = vector.extract_strided_slice %30 {offsets = [0, 0, 8], sizes = [1, 8, 4], strides = [1, 1, 1]} : vector<1x8x32xf32> to vector<1x8x4xf32>
    %83 = arith.truncf %82 : vector<1x8x4xf32> to vector<1x8x4xbf16>
    "tpu.trace_start"() <{level = 10 : i32, message = "bqd,bkd->bqk"}> : () -> ()
    %cst_21 = arith.constant dense<0.000000e+00> : vector<1x8x8xf32>
    %84 = tpu.matmul %79, %81, %cst_21 {dimension_numbers = #tpu.dot_dimension_numbers<[2], [2], [1], [1], [0, 0, 0, 1, 1, 1], [0], [0]>} : vector<1x8x4xbf16>, vector<1x8x4xbf16>, vector<1x8x8xf32> -> vector<1x8x8xf32>
    "tpu.trace_stop"() : () -> ()
    %cst_22 = arith.constant 5.000000e-01 : f32
    %85 = vector.broadcast %cst_22 : f32 to vector<1x8x8xf32>
    %86 = arith.mulf %84, %85 : vector<1x8x8xf32>
    %87 = vector.broadcast %31 : vector<1x1x8xf32> to vector<1x8x8xf32>
    %88 = arith.addf %86, %87 : vector<1x8x8xf32>
    %cst_23 = arith.constant dense<0xFF800000> : vector<1x8xf32>
    %89 = vector.multi_reduction <maximumf>, %88, %cst_23 [2] : vector<1x8x8xf32> to vector<1x8xf32>
    %90 = vector.shape_cast %89 : vector<1x8xf32> to vector<1x8x1xf32>
    %91 = vector.broadcast %90 : vector<1x8x1xf32> to vector<1x8x8xf32>
    %92 = arith.subf %88, %91 : vector<1x8x8xf32>
    %93 = math.exp %92 : vector<1x8x8xf32>
    %cst_24 = arith.constant dense<0.000000e+00> : vector<1x8xf32>
    %94 = vector.multi_reduction <add>, %93, %cst_24 [2] : vector<1x8x8xf32> to vector<1x8xf32>
    %95 = vector.shape_cast %94 : vector<1x8xf32> to vector<1x8x1xf32>
    %96 = tpu.reciprocal %95 {approx = true} : vector<1x8x1xf32> -> vector<1x8x1xf32>
    %97 = vector.broadcast %96 : vector<1x8x1xf32> to vector<1x8x8xf32>
    %98 = arith.mulf %93, %97 : vector<1x8x8xf32>
    %99 = arith.truncf %98 : vector<1x8x8xf32> to vector<1x8x8xbf16>
    "tpu.trace_start"() <{level = 10 : i32, message = "bqk,bkd->bqd"}> : () -> ()
    %cst_25 = arith.constant dense<0.000000e+00> : vector<1x8x4xf32>
    %100 = tpu.matmul %99, %83, %cst_25 {dimension_numbers = #tpu.dot_dimension_numbers<[2], [1], [1], [2], [0, 0, 0, 1, 1, 2], [0], [0]>} : vector<1x8x8xbf16>, vector<1x8x4xbf16>, vector<1x8x4xf32> -> vector<1x8x4xf32>
    "tpu.trace_stop"() : () -> ()
    %101 = vector.extract_strided_slice %22 {offsets = [0, 0, 12], sizes = [1, 8, 4], strides = [1, 1, 1]} : vector<1x8x32xf32> to vector<1x8x4xf32>
    %102 = arith.truncf %101 : vector<1x8x4xf32> to vector<1x8x4xbf16>
    %103 = vector.extract_strided_slice %26 {offsets = [0, 0, 12], sizes = [1, 8, 4], strides = [1, 1, 1]} : vector<1x8x32xf32> to vector<1x8x4xf32>
    %104 = arith.truncf %103 : vector<1x8x4xf32> to vector<1x8x4xbf16>
    %105 = vector.extract_strided_slice %30 {offsets = [0, 0, 12], sizes = [1, 8, 4], strides = [1, 1, 1]} : vector<1x8x32xf32> to vector<1x8x4xf32>
    %106 = arith.truncf %105 : vector<1x8x4xf32> to vector<1x8x4xbf16>
    "tpu.trace_start"() <{level = 10 : i32, message = "bqd,bkd->bqk"}> : () -> ()
    %cst_26 = arith.constant dense<0.000000e+00> : vector<1x8x8xf32>
    %107 = tpu.matmul %102, %104, %cst_26 {dimension_numbers = #tpu.dot_dimension_numbers<[2], [2], [1], [1], [0, 0, 0, 1, 1, 1], [0], [0]>} : vector<1x8x4xbf16>, vector<1x8x4xbf16>, vector<1x8x8xf32> -> vector<1x8x8xf32>
    "tpu.trace_stop"() : () -> ()
    %cst_27 = arith.constant 5.000000e-01 : f32
    %108 = vector.broadcast %cst_27 : f32 to vector<1x8x8xf32>
    %109 = arith.mulf %107, %108 : vector<1x8x8xf32>
    %110 = vector.broadcast %31 : vector<1x1x8xf32> to vector<1x8x8xf32>
    %111 = arith.addf %109, %110 : vector<1x8x8xf32>
    %cst_28 = arith.constant dense<0xFF800000> : vector<1x8xf32>
    %112 = vector.multi_reduction <maximumf>, %111, %cst_28 [2] : vector<1x8x8xf32> to vector<1x8xf32>
    %113 = vector.shape_cast %112 : vector<1x8xf32> to vector<1x8x1xf32>
    %114 = vector.broadcast %113 : vector<1x8x1xf32> to vector<1x8x8xf32>
    %115 = arith.subf %111, %114 : vector<1x8x8xf32>
    %116 = math.exp %115 : vector<1x8x8xf32>
    %cst_29 = arith.constant dense<0.000000e+00> : vector<1x8xf32>
    %117 = vector.multi_reduction <add>, %116, %cst_29 [2] : vector<1x8x8xf32> to vector<1x8xf32>
    %118 = vector.shape_cast %117 : vector<1x8xf32> to vector<1x8x1xf32>
    %119 = tpu.reciprocal %118 {approx = true} : vector<1x8x1xf32> -> vector<1x8x1xf32>
    %120 = vector.broadcast %119 : vector<1x8x1xf32> to vector<1x8x8xf32>
    %121 = arith.mulf %116, %120 : vector<1x8x8xf32>
    %122 = arith.truncf %121 : vector<1x8x8xf32> to vector<1x8x8xbf16>
    "tpu.trace_start"() <{level = 10 : i32, message = "bqk,bkd->bqd"}> : () -> ()
    %cst_30 = arith.constant dense<0.000000e+00> : vector<1x8x4xf32>
    %123 = tpu.matmul %122, %106, %cst_30 {dimension_numbers = #tpu.dot_dimension_numbers<[2], [1], [1], [2], [0, 0, 0, 1, 1, 2], [0], [0]>} : vector<1x8x8xbf16>, vector<1x8x4xbf16>, vector<1x8x4xf32> -> vector<1x8x4xf32>
    "tpu.trace_stop"() : () -> ()
    %124 = vector.extract_strided_slice %22 {offsets = [0, 0, 16], sizes = [1, 8, 4], strides = [1, 1, 1]} : vector<1x8x32xf32> to vector<1x8x4xf32>
    %125 = arith.truncf %124 : vector<1x8x4xf32> to vector<1x8x4xbf16>
    %126 = vector.extract_strided_slice %26 {offsets = [0, 0, 16], sizes = [1, 8, 4], strides = [1, 1, 1]} : vector<1x8x32xf32> to vector<1x8x4xf32>
    %127 = arith.truncf %126 : vector<1x8x4xf32> to vector<1x8x4xbf16>
    %128 = vector.extract_strided_slice %30 {offsets = [0, 0, 16], sizes = [1, 8, 4], strides = [1, 1, 1]} : vector<1x8x32xf32> to vector<1x8x4xf32>
    %129 = arith.truncf %128 : vector<1x8x4xf32> to vector<1x8x4xbf16>
    "tpu.trace_start"() <{level = 10 : i32, message = "bqd,bkd->bqk"}> : () -> ()
    %cst_31 = arith.constant dense<0.000000e+00> : vector<1x8x8xf32>
    %130 = tpu.matmul %125, %127, %cst_31 {dimension_numbers = #tpu.dot_dimension_numbers<[2], [2], [1], [1], [0, 0, 0, 1, 1, 1], [0], [0]>} : vector<1x8x4xbf16>, vector<1x8x4xbf16>, vector<1x8x8xf32> -> vector<1x8x8xf32>
    "tpu.trace_stop"() : () -> ()
    %cst_32 = arith.constant 5.000000e-01 : f32
    %131 = vector.broadcast %cst_32 : f32 to vector<1x8x8xf32>
    %132 = arith.mulf %130, %131 : vector<1x8x8xf32>
    %133 = vector.broadcast %31 : vector<1x1x8xf32> to vector<1x8x8xf32>
    %134 = arith.addf %132, %133 : vector<1x8x8xf32>
    %cst_33 = arith.constant dense<0xFF800000> : vector<1x8xf32>
    %135 = vector.multi_reduction <maximumf>, %134, %cst_33 [2] : vector<1x8x8xf32> to vector<1x8xf32>
    %136 = vector.shape_cast %135 : vector<1x8xf32> to vector<1x8x1xf32>
    %137 = vector.broadcast %136 : vector<1x8x1xf32> to vector<1x8x8xf32>
    %138 = arith.subf %134, %137 : vector<1x8x8xf32>
    %139 = math.exp %138 : vector<1x8x8xf32>
    %cst_34 = arith.constant dense<0.000000e+00> : vector<1x8xf32>
    %140 = vector.multi_reduction <add>, %139, %cst_34 [2] : vector<1x8x8xf32> to vector<1x8xf32>
    %141 = vector.shape_cast %140 : vector<1x8xf32> to vector<1x8x1xf32>
    %142 = tpu.reciprocal %141 {approx = true} : vector<1x8x1xf32> -> vector<1x8x1xf32>
    %143 = vector.broadcast %142 : vector<1x8x1xf32> to vector<1x8x8xf32>
    %144 = arith.mulf %139, %143 : vector<1x8x8xf32>
    %145 = arith.truncf %144 : vector<1x8x8xf32> to vector<1x8x8xbf16>
    "tpu.trace_start"() <{level = 10 : i32, message = "bqk,bkd->bqd"}> : () -> ()
    %cst_35 = arith.constant dense<0.000000e+00> : vector<1x8x4xf32>
    %146 = tpu.matmul %145, %129, %cst_35 {dimension_numbers = #tpu.dot_dimension_numbers<[2], [1], [1], [2], [0, 0, 0, 1, 1, 2], [0], [0]>} : vector<1x8x8xbf16>, vector<1x8x4xbf16>, vector<1x8x4xf32> -> vector<1x8x4xf32>
    "tpu.trace_stop"() : () -> ()
    %147 = vector.extract_strided_slice %22 {offsets = [0, 0, 20], sizes = [1, 8, 4], strides = [1, 1, 1]} : vector<1x8x32xf32> to vector<1x8x4xf32>
    %148 = arith.truncf %147 : vector<1x8x4xf32> to vector<1x8x4xbf16>
    %149 = vector.extract_strided_slice %26 {offsets = [0, 0, 20], sizes = [1, 8, 4], strides = [1, 1, 1]} : vector<1x8x32xf32> to vector<1x8x4xf32>
    %150 = arith.truncf %149 : vector<1x8x4xf32> to vector<1x8x4xbf16>
    %151 = vector.extract_strided_slice %30 {offsets = [0, 0, 20], sizes = [1, 8, 4], strides = [1, 1, 1]} : vector<1x8x32xf32> to vector<1x8x4xf32>
    %152 = arith.truncf %151 : vector<1x8x4xf32> to vector<1x8x4xbf16>
    "tpu.trace_start"() <{level = 10 : i32, message = "bqd,bkd->bqk"}> : () -> ()
    %cst_36 = arith.constant dense<0.000000e+00> : vector<1x8x8xf32>
    %153 = tpu.matmul %148, %150, %cst_36 {dimension_numbers = #tpu.dot_dimension_numbers<[2], [2], [1], [1], [0, 0, 0, 1, 1, 1], [0], [0]>} : vector<1x8x4xbf16>, vector<1x8x4xbf16>, vector<1x8x8xf32> -> vector<1x8x8xf32>
    "tpu.trace_stop"() : () -> ()
    %cst_37 = arith.constant 5.000000e-01 : f32
    %154 = vector.broadcast %cst_37 : f32 to vector<1x8x8xf32>
    %155 = arith.mulf %153, %154 : vector<1x8x8xf32>
    %156 = vector.broadcast %31 : vector<1x1x8xf32> to vector<1x8x8xf32>
    %157 = arith.addf %155, %156 : vector<1x8x8xf32>
    %cst_38 = arith.constant dense<0xFF800000> : vector<1x8xf32>
    %158 = vector.multi_reduction <maximumf>, %157, %cst_38 [2] : vector<1x8x8xf32> to vector<1x8xf32>
    %159 = vector.shape_cast %158 : vector<1x8xf32> to vector<1x8x1xf32>
    %160 = vector.broadcast %159 : vector<1x8x1xf32> to vector<1x8x8xf32>
    %161 = arith.subf %157, %160 : vector<1x8x8xf32>
    %162 = math.exp %161 : vector<1x8x8xf32>
    %cst_39 = arith.constant dense<0.000000e+00> : vector<1x8xf32>
    %163 = vector.multi_reduction <add>, %162, %cst_39 [2] : vector<1x8x8xf32> to vector<1x8xf32>
    %164 = vector.shape_cast %163 : vector<1x8xf32> to vector<1x8x1xf32>
    %165 = tpu.reciprocal %164 {approx = true} : vector<1x8x1xf32> -> vector<1x8x1xf32>
    %166 = vector.broadcast %165 : vector<1x8x1xf32> to vector<1x8x8xf32>
    %167 = arith.mulf %162, %166 : vector<1x8x8xf32>
    %168 = arith.truncf %167 : vector<1x8x8xf32> to vector<1x8x8xbf16>
    "tpu.trace_start"() <{level = 10 : i32, message = "bqk,bkd->bqd"}> : () -> ()
    %cst_40 = arith.constant dense<0.000000e+00> : vector<1x8x4xf32>
    %169 = tpu.matmul %168, %152, %cst_40 {dimension_numbers = #tpu.dot_dimension_numbers<[2], [1], [1], [2], [0, 0, 0, 1, 1, 2], [0], [0]>} : vector<1x8x8xbf16>, vector<1x8x4xbf16>, vector<1x8x4xf32> -> vector<1x8x4xf32>
    "tpu.trace_stop"() : () -> ()
    %170 = vector.extract_strided_slice %22 {offsets = [0, 0, 24], sizes = [1, 8, 4], strides = [1, 1, 1]} : vector<1x8x32xf32> to vector<1x8x4xf32>
    %171 = arith.truncf %170 : vector<1x8x4xf32> to vector<1x8x4xbf16>
    %172 = vector.extract_strided_slice %26 {offsets = [0, 0, 24], sizes = [1, 8, 4], strides = [1, 1, 1]} : vector<1x8x32xf32> to vector<1x8x4xf32>
    %173 = arith.truncf %172 : vector<1x8x4xf32> to vector<1x8x4xbf16>
    %174 = vector.extract_strided_slice %30 {offsets = [0, 0, 24], sizes = [1, 8, 4], strides = [1, 1, 1]} : vector<1x8x32xf32> to vector<1x8x4xf32>
    %175 = arith.truncf %174 : vector<1x8x4xf32> to vector<1x8x4xbf16>
    "tpu.trace_start"() <{level = 10 : i32, message = "bqd,bkd->bqk"}> : () -> ()
    %cst_41 = arith.constant dense<0.000000e+00> : vector<1x8x8xf32>
    %176 = tpu.matmul %171, %173, %cst_41 {dimension_numbers = #tpu.dot_dimension_numbers<[2], [2], [1], [1], [0, 0, 0, 1, 1, 1], [0], [0]>} : vector<1x8x4xbf16>, vector<1x8x4xbf16>, vector<1x8x8xf32> -> vector<1x8x8xf32>
    "tpu.trace_stop"() : () -> ()
    %cst_42 = arith.constant 5.000000e-01 : f32
    %177 = vector.broadcast %cst_42 : f32 to vector<1x8x8xf32>
    %178 = arith.mulf %176, %177 : vector<1x8x8xf32>
    %179 = vector.broadcast %31 : vector<1x1x8xf32> to vector<1x8x8xf32>
    %180 = arith.addf %178, %179 : vector<1x8x8xf32>
    %cst_43 = arith.constant dense<0xFF800000> : vector<1x8xf32>
    %181 = vector.multi_reduction <maximumf>, %180, %cst_43 [2] : vector<1x8x8xf32> to vector<1x8xf32>
    %182 = vector.shape_cast %181 : vector<1x8xf32> to vector<1x8x1xf32>
    %183 = vector.broadcast %182 : vector<1x8x1xf32> to vector<1x8x8xf32>
    %184 = arith.subf %180, %183 : vector<1x8x8xf32>
    %185 = math.exp %184 : vector<1x8x8xf32>
    %cst_44 = arith.constant dense<0.000000e+00> : vector<1x8xf32>
    %186 = vector.multi_reduction <add>, %185, %cst_44 [2] : vector<1x8x8xf32> to vector<1x8xf32>
    %187 = vector.shape_cast %186 : vector<1x8xf32> to vector<1x8x1xf32>
    %188 = tpu.reciprocal %187 {approx = true} : vector<1x8x1xf32> -> vector<1x8x1xf32>
    %189 = vector.broadcast %188 : vector<1x8x1xf32> to vector<1x8x8xf32>
    %190 = arith.mulf %185, %189 : vector<1x8x8xf32>
    %191 = arith.truncf %190 : vector<1x8x8xf32> to vector<1x8x8xbf16>
    "tpu.trace_start"() <{level = 10 : i32, message = "bqk,bkd->bqd"}> : () -> ()
    %cst_45 = arith.constant dense<0.000000e+00> : vector<1x8x4xf32>
    %192 = tpu.matmul %191, %175, %cst_45 {dimension_numbers = #tpu.dot_dimension_numbers<[2], [1], [1], [2], [0, 0, 0, 1, 1, 2], [0], [0]>} : vector<1x8x8xbf16>, vector<1x8x4xbf16>, vector<1x8x4xf32> -> vector<1x8x4xf32>
    "tpu.trace_stop"() : () -> ()
    %193 = vector.extract_strided_slice %22 {offsets = [0, 0, 28], sizes = [1, 8, 4], strides = [1, 1, 1]} : vector<1x8x32xf32> to vector<1x8x4xf32>
    %194 = arith.truncf %193 : vector<1x8x4xf32> to vector<1x8x4xbf16>
    %195 = vector.extract_strided_slice %26 {offsets = [0, 0, 28], sizes = [1, 8, 4], strides = [1, 1, 1]} : vector<1x8x32xf32> to vector<1x8x4xf32>
    %196 = arith.truncf %195 : vector<1x8x4xf32> to vector<1x8x4xbf16>
    %197 = vector.extract_strided_slice %30 {offsets = [0, 0, 28], sizes = [1, 8, 4], strides = [1, 1, 1]} : vector<1x8x32xf32> to vector<1x8x4xf32>
    %198 = arith.truncf %197 : vector<1x8x4xf32> to vector<1x8x4xbf16>
    "tpu.trace_start"() <{level = 10 : i32, message = "bqd,bkd->bqk"}> : () -> ()
    %cst_46 = arith.constant dense<0.000000e+00> : vector<1x8x8xf32>
    %199 = tpu.matmul %194, %196, %cst_46 {dimension_numbers = #tpu.dot_dimension_numbers<[2], [2], [1], [1], [0, 0, 0, 1, 1, 1], [0], [0]>} : vector<1x8x4xbf16>, vector<1x8x4xbf16>, vector<1x8x8xf32> -> vector<1x8x8xf32>
    "tpu.trace_stop"() : () -> ()
    %cst_47 = arith.constant 5.000000e-01 : f32
    %200 = vector.broadcast %cst_47 : f32 to vector<1x8x8xf32>
    %201 = arith.mulf %199, %200 : vector<1x8x8xf32>
    %202 = vector.broadcast %31 : vector<1x1x8xf32> to vector<1x8x8xf32>
    %203 = arith.addf %201, %202 : vector<1x8x8xf32>
    %cst_48 = arith.constant dense<0xFF800000> : vector<1x8xf32>
    %204 = vector.multi_reduction <maximumf>, %203, %cst_48 [2] : vector<1x8x8xf32> to vector<1x8xf32>
    %205 = vector.shape_cast %204 : vector<1x8xf32> to vector<1x8x1xf32>
    %206 = vector.broadcast %205 : vector<1x8x1xf32> to vector<1x8x8xf32>
    %207 = arith.subf %203, %206 : vector<1x8x8xf32>
    %208 = math.exp %207 : vector<1x8x8xf32>
    %cst_49 = arith.constant dense<0.000000e+00> : vector<1x8xf32>
    %209 = vector.multi_reduction <add>, %208, %cst_49 [2] : vector<1x8x8xf32> to vector<1x8xf32>
    %210 = vector.shape_cast %209 : vector<1x8xf32> to vector<1x8x1xf32>
    %211 = tpu.reciprocal %210 {approx = true} : vector<1x8x1xf32> -> vector<1x8x1xf32>
    %212 = vector.broadcast %211 : vector<1x8x1xf32> to vector<1x8x8xf32>
    %213 = arith.mulf %208, %212 : vector<1x8x8xf32>
    %214 = arith.truncf %213 : vector<1x8x8xf32> to vector<1x8x8xbf16>
    "tpu.trace_start"() <{level = 10 : i32, message = "bqk,bkd->bqd"}> : () -> ()
    %cst_50 = arith.constant dense<0.000000e+00> : vector<1x8x4xf32>
    %215 = tpu.matmul %214, %198, %cst_50 {dimension_numbers = #tpu.dot_dimension_numbers<[2], [1], [1], [2], [0, 0, 0, 1, 1, 2], [0], [0]>} : vector<1x8x8xbf16>, vector<1x8x4xbf16>, vector<1x8x4xf32> -> vector<1x8x4xf32>
    "tpu.trace_stop"() : () -> ()
    %216 = tpu.concatenate %54, %77, %100, %123, %146, %169, %192, %215 in 2 : vector<1x8x4xf32>, vector<1x8x4xf32>, vector<1x8x4xf32>, vector<1x8x4xf32>, vector<1x8x4xf32>, vector<1x8x4xf32>, vector<1x8x4xf32>, vector<1x8x4xf32> -> vector<1x8x32xf32>
    %217 = vector.shape_cast %216 : vector<1x8x32xf32> to vector<8x32xf32>
    %218 = arith.truncf %217 : vector<8x32xf32> to vector<8x32xbf16>
    %c0_51 = arith.constant 0 : index
    %c0_52 = arith.constant 0 : index
    %c0_53 = arith.constant 0 : index
    %219 = vector.load %arg7[%c0_51, %c0_52, %c0_53] : memref<1x32x32xbf16, #tpu.memory_space<vmem>>, vector<1x32x32xbf16>
    %220 = vector.shape_cast %219 : vector<1x32x32xbf16> to vector<32x32xbf16>
    %cst_54 = arith.constant dense<0.000000e+00> : vector<8x32xf32>
    %221 = tpu.matmul %218, %220, %cst_54 {dimension_numbers = #tpu.dot_dimension_numbers<[1], [0], [0], [1], [0, 0, 1, 1], [], []>} : vector<8x32xbf16>, vector<32x32xbf16>, vector<8x32xf32> -> vector<8x32xf32>
    %222 = vector.broadcast %10 : vector<1x32xf32> to vector<8x32xf32>
    %223 = arith.addf %221, %222 : vector<8x32xf32>
    %224 = arith.addf %3, %223 : vector<8x32xf32>
    %cst_55 = arith.constant dense<0.000000e+00> : vector<8xf32>
    %225 = vector.multi_reduction <add>, %224, %cst_55 [1] : vector<8x32xf32> to vector<8xf32>
    %226 = vector.shape_cast %225 : vector<8xf32> to vector<8x1xf32>
    %cst_56 = arith.constant 3.200000e+01 : f32
    %227 = vector.broadcast %cst_56 : f32 to vector<8x1xf32>
    %228 = arith.divf %226, %227 : vector<8x1xf32>
    %229 = vector.broadcast %228 : vector<8x1xf32> to vector<8x32xf32>
    %230 = arith.subf %224, %229 : vector<8x32xf32>
    %231 = arith.mulf %230, %230 : vector<8x32xf32>
    %cst_57 = arith.constant dense<0.000000e+00> : vector<8xf32>
    %232 = vector.multi_reduction <add>, %231, %cst_57 [1] : vector<8x32xf32> to vector<8xf32>
    %233 = vector.shape_cast %232 : vector<8xf32> to vector<8x1xf32>
    %cst_58 = arith.constant 3.200000e+01 : f32
    %234 = vector.broadcast %cst_58 : f32 to vector<8x1xf32>
    %235 = arith.divf %233, %234 : vector<8x1xf32>
    %236 = vector.broadcast %228 : vector<8x1xf32> to vector<8x32xf32>
    %237 = arith.subf %224, %236 : vector<8x32xf32>
    %cst_59 = arith.constant 9.99999974E-6 : f32
    %238 = vector.broadcast %cst_59 : f32 to vector<8x1xf32>
    %239 = arith.addf %235, %238 : vector<8x1xf32>
    %240 = math.rsqrt %239 : vector<8x1xf32>
    %241 = vector.broadcast %240 : vector<8x1xf32> to vector<8x32xf32>
    %242 = arith.mulf %237, %241 : vector<8x32xf32>
    %243 = vector.broadcast %11 : vector<1x32xf32> to vector<8x32xf32>
    %244 = arith.mulf %242, %243 : vector<8x32xf32>
    %245 = vector.broadcast %12 : vector<1x32xf32> to vector<8x32xf32>
    %246 = arith.addf %244, %245 : vector<8x32xf32>
    %247 = arith.truncf %246 : vector<8x32xf32> to vector<8x32xbf16>
    %c0_60 = arith.constant 0 : index
    %c0_61 = arith.constant 0 : index
    %c0_62 = arith.constant 0 : index
    %248 = vector.load %arg8[%c0_60, %c0_61, %c0_62] : memref<1x32x64xbf16, #tpu.memory_space<vmem>>, vector<1x32x64xbf16>
    %249 = vector.shape_cast %248 : vector<1x32x64xbf16> to vector<32x64xbf16>
    %cst_63 = arith.constant dense<0.000000e+00> : vector<8x64xf32>
    %250 = tpu.matmul %247, %249, %cst_63 {dimension_numbers = #tpu.dot_dimension_numbers<[1], [0], [0], [1], [0, 0, 1, 1], [], []>} : vector<8x32xbf16>, vector<32x64xbf16>, vector<8x64xf32> -> vector<8x64xf32>
    %c0_64 = arith.constant 0 : index
    %c0_65 = arith.constant 0 : index
    %c0_66 = arith.constant 0 : index
    %251 = vector.load %arg11[%c0_64, %c0_65, %c0_66] : memref<1x1x64xf32, #tpu.memory_space<vmem>>, vector<1x1x64xf32>
    %252 = vector.shape_cast %251 : vector<1x1x64xf32> to vector<1x64xf32>
    %253 = vector.broadcast %252 : vector<1x64xf32> to vector<8x64xf32>
    %254 = arith.addf %250, %253 : vector<8x64xf32>
    %cst_67 = arith.constant 0.000000e+00 : f32
    %255 = vector.broadcast %cst_67 : f32 to vector<8x64xf32>
    %256 = arith.maximumf %254, %255 : vector<8x64xf32>
    %257 = arith.truncf %256 : vector<8x64xf32> to vector<8x64xbf16>
    %c0_68 = arith.constant 0 : index
    %c0_69 = arith.constant 0 : index
    %c0_70 = arith.constant 0 : index
    %258 = vector.load %arg9[%c0_68, %c0_69, %c0_70] : memref<1x64x32xbf16, #tpu.memory_space<vmem>>, vector<1x64x32xbf16>
    %259 = vector.shape_cast %258 : vector<1x64x32xbf16> to vector<64x32xbf16>
    %cst_71 = arith.constant dense<0.000000e+00> : vector<8x32xf32>
    %260 = tpu.matmul %257, %259, %cst_71 {dimension_numbers = #tpu.dot_dimension_numbers<[1], [0], [0], [1], [0, 0, 1, 1], [], []>} : vector<8x64xbf16>, vector<64x32xbf16>, vector<8x32xf32> -> vector<8x32xf32>
    %261 = vector.broadcast %13 : vector<1x32xf32> to vector<8x32xf32>
    %262 = arith.addf %260, %261 : vector<8x32xf32>
    %263 = arith.addf %246, %262 : vector<8x32xf32>
    %cst_72 = arith.constant dense<0.000000e+00> : vector<8xf32>
    %264 = vector.multi_reduction <add>, %263, %cst_72 [1] : vector<8x32xf32> to vector<8xf32>
    %265 = vector.shape_cast %264 : vector<8xf32> to vector<8x1xf32>
    %cst_73 = arith.constant 3.200000e+01 : f32
    %266 = vector.broadcast %cst_73 : f32 to vector<8x1xf32>
    %267 = arith.divf %265, %266 : vector<8x1xf32>
    %268 = vector.broadcast %267 : vector<8x1xf32> to vector<8x32xf32>
    %269 = arith.subf %263, %268 : vector<8x32xf32>
    %270 = arith.mulf %269, %269 : vector<8x32xf32>
    %cst_74 = arith.constant dense<0.000000e+00> : vector<8xf32>
    %271 = vector.multi_reduction <add>, %270, %cst_74 [1] : vector<8x32xf32> to vector<8xf32>
    %272 = vector.shape_cast %271 : vector<8xf32> to vector<8x1xf32>
    %cst_75 = arith.constant 3.200000e+01 : f32
    %273 = vector.broadcast %cst_75 : f32 to vector<8x1xf32>
    %274 = arith.divf %272, %273 : vector<8x1xf32>
    %275 = vector.broadcast %267 : vector<8x1xf32> to vector<8x32xf32>
    %276 = arith.subf %263, %275 : vector<8x32xf32>
    %cst_76 = arith.constant 9.99999974E-6 : f32
    %277 = vector.broadcast %cst_76 : f32 to vector<8x1xf32>
    %278 = arith.addf %274, %277 : vector<8x1xf32>
    %279 = math.rsqrt %278 : vector<8x1xf32>
    %280 = vector.broadcast %279 : vector<8x1xf32> to vector<8x32xf32>
    %281 = arith.mulf %276, %280 : vector<8x32xf32>
    %282 = vector.broadcast %14 : vector<1x32xf32> to vector<8x32xf32>
    %283 = arith.mulf %281, %282 : vector<8x32xf32>
    %284 = vector.broadcast %15 : vector<1x32xf32> to vector<8x32xf32>
    %285 = arith.addf %283, %284 : vector<8x32xf32>
    %c0_77 = arith.constant 0 : index
    %c0_78 = arith.constant 0 : index
    %286 = vector.load %arg13[%c0_77, %c0_78] : memref<8x32xf32, #tpu.memory_space<vmem>>, vector<8x32xf32>
    tpu.vector_store %arg13[%c0_77, %c0_78], %285 {strides = array<i32>} : memref<8x32xf32, #tpu.memory_space<vmem>>, vector<8x32xf32>,
    %c1_i32 = arith.constant 1 : i32
    %287 = arith.cmpi eq, %arg1, %c1_i32 : i32
    %288 = arith.extui %287 : i1 to i32
    %c0_i32_79 = arith.constant 0 : i32
    %289 = arith.cmpi ne, %288, %c0_i32_79 : i32
    scf.if %289 {
      %290 = vector.shape_cast %285 : vector<8x32xf32> to vector<1x8x32xf32>
      %291 = arith.truncf %290 : vector<1x8x32xf32> to vector<1x8x32xbf16>
      %c0_80 = arith.constant 0 : index
      %c0_81 = arith.constant 0 : index
      %c0_82 = arith.constant 0 : index
      %292 = vector.load %arg12[%c0_80, %c0_81, %c0_82] : memref<1x8x32xbf16, #tpu.memory_space<vmem>>, vector<1x8x32xbf16>
      tpu.vector_store %arg12[%c0_80, %c0_81, %c0_82], %291 {strides = array<i32>} : memref<1x8x32xbf16, #tpu.memory_space<vmem>>, vector<1x8x32xbf16>,
    } else {
    }
    return
  }
  func.func @transform_0(%arg0: i32, %arg1: i32) -> (i32, i32, i32) {
    %c0_i32 = arith.constant 0 : i32
    %c0_i32_0 = arith.constant 0 : i32
    %c0_i32_1 = arith.constant 0 : i32
    return %arg0, %c0_i32, %c0_i32_0 : i32, i32, i32
  }
  func.func @transform_1(%arg0: i32, %arg1: i32) -> (i32, i32, i32) {
    %c0_i32 = arith.constant 0 : i32
    %c0_i32_0 = arith.constant 0 : i32
    %c0_i32_1 = arith.constant 0 : i32
    return %arg0, %c0_i32, %c0_i32_0 : i32, i32, i32
  }
  func.func @transform_2(%arg0: i32, %arg1: i32) -> (i32, i32) {
    %c0_i32 = arith.constant 0 : i32
    %c0_i32_0 = arith.constant 0 : i32
    %c0_i32_1 = arith.constant 0 : i32
    return %c0_i32, %c0_i32_0 : i32, i32
  }
  func.func @transform_3(%arg0: i32, %arg1: i32) -> (i32, i32) {
    %c0_i32 = arith.constant 0 : i32
    %c0_i32_0 = arith.constant 0 : i32
    %c0_i32_1 = arith.constant 0 : i32
    return %c0_i32, %c0_i32_0 : i32, i32
  }
  func.func @transform_4(%arg0: i32, %arg1: i32) -> (i32, i32, i32) {
    %c0_i32 = arith.constant 0 : i32
    %c0_i32_0 = arith.constant 0 : i32
    %c0_i32_1 = arith.constant 0 : i32
    return %arg1, %c0_i32, %c0_i32_0 : i32, i32, i32
  }
  func.func @transform_5(%arg0: i32, %arg1: i32) -> (i32, i32, i32) {
    %c0_i32 = arith.constant 0 : i32
    %c0_i32_0 = arith.constant 0 : i32
    %c0_i32_1 = arith.constant 0 : i32
    return %arg1, %c0_i32, %c0_i32_0 : i32, i32, i32
  }
  func.func @transform_6(%arg0: i32, %arg1: i32) -> (i32, i32, i32) {
    %c0_i32 = arith.constant 0 : i32
    %c0_i32_0 = arith.constant 0 : i32
    %c0_i32_1 = arith.constant 0 : i32
    return %arg1, %c0_i32, %c0_i32_0 : i32, i32, i32
  }
  func.func @transform_7(%arg0: i32, %arg1: i32) -> (i32, i32, i32) {
    %c0_i32 = arith.constant 0 : i32
    %c0_i32_0 = arith.constant 0 : i32
    %c0_i32_1 = arith.constant 0 : i32
    return %arg1, %c0_i32, %c0_i32_0 : i32, i32, i32
  }
  func.func @transform_8(%arg0: i32, %arg1: i32) -> (i32, i32, i32) {
    %c0_i32 = arith.constant 0 : i32
    %c0_i32_0 = arith.constant 0 : i32
    %c0_i32_1 = arith.constant 0 : i32
    return %arg1, %c0_i32, %c0_i32_0 : i32, i32, i32
  }
  func.func @transform_9(%arg0: i32, %arg1: i32) -> (i32, i32, i32) {
    %c0_i32 = arith.constant 0 : i32
    %c0_i32_0 = arith.constant 0 : i32
    %c0_i32_1 = arith.constant 0 : i32
    return %arg1, %c0_i32, %c0_i32_0 : i32, i32, i32
  }
  func.func @transform_10(%arg0: i32, %arg1: i32) -> (i32, i32, i32) {
    %c0_i32 = arith.constant 0 : i32
    %c0_i32_0 = arith.constant 0 : i32
    %c0_i32_1 = arith.constant 0 : i32
    return %arg0, %c0_i32, %c0_i32_0 : i32, i32, i32
  }
}

</mosaic_0001>

<bundles_post_ra>
// kernel: tpu_custom_call.1
= control target key start
LH: loop header
LB: loop body
LE: loop exit
PB: predicated region body
PF: predicated region fallthrough
CT: control target
= control target key end

     0   :  { %s3120_s0 = inlined_call_operand.vmem [shape: f32[2,8,96], index: 0, kind: input, shape index: {}]   ;;  %s3121_s1 = inlined_call_operand.vmem [shape: f32[2,1,8], index: 1, kind: input, shape index: {}]   ;;  %s3122_s2 = inlined_call_operand.vmem [shape: bf16[96,32], index: 2, kind: input, shape index: {}]   ;;  %s3123_s3 = inlined_call_operand.vmem [shape: f32[8,32], index: 3, kind: input, shape index: {}]   ;;  %s3124_s4 = inlined_call_operand.vmem [shape: bf16[2,32,96], index: 4, kind: input, shape index: {}]   ;;  %s3125_s5 = inlined_call_operand.vmem [shape: bf16[2,32,32], index: 5, kind: input, shape index: {}]   ;;  %s3126_s6 = inlined_call_operand.vmem [shape: bf16[2,32,64], index: 6, kind: input, shape index: {}]   ;;  %s3127_s7 = inlined_call_operand.vmem [shape: bf16[2,64,32], index: 7, kind: input, shape index: {}]   ;;  %s3128_s8 = inlined_call_operand.vmem [shape: f32[2,9,32], index: 8, kind: input, shape index: {}]   ;;  %s3129_s9 = inlined_call_operand.vmem [shape: f32[2,1,64], index: 9, kind: input, shape index: {}]   ;;  %s3130_s10 = inlined_call_operand.hbm [shape: bf16[2,8,32], index: 10, kind: output, shape index: {}]  }
   0x1   :  { %3144 = sst [smem:[#allocation17_spill]] %s3120_s0 }
   0x2   :  { %3145 = sst [smem:[#allocation18_spill]] %s3124_s4 }
   0x3   :  { %3146 = sst [smem:[#allocation19_spill]] %s3130_s10 }
   0x4   :  { %15 = vsyncpa [#allocation4], 0 }
   0x5   :  { %17 = vsyncpa [#allocation4 + $0x1], 0  ;;  %s2681_s13 = smov 0   ;;  %s2683_s14 = smov 0  }
   0x6   :  { %s2685_s15 = smov 0   ;;  %s2687_s16 = smov 0  }
   0x7   :  { %s2689_s17 = smov 0   ;;  %s2691_s18 = smov 0  }
   0x8   :  { %s2693_s19 = smov 0   ;;  %s2695_s20 = smov 0  }
   0x9 LB: > { %3147 = sst [smem:[#allocation6_spill]] %s2560_s13  ;;  %s2067_s21 = sadd.s32 4294967295, %s2588_s20   ;;  %s2588_s20 = sphi %s2695_s20, %s23_s20   ;;  %s2584_s19 = sphi %s2693_s19, %s3176_s19   ;;  %s2580_s18 = sphi %s2691_s18, %s3175_s18   ;;  %s2576_s17 = sphi %s2689_s17, %s3174_s17   ;;  %s2572_s16 = sphi %s2687_s16, %s3173_s16   ;;  %s2568_s15 = sphi %s2685_s15, %s3172_s15   ;;  %s2564_s14 = sphi %s2683_s14, %s3171_s14   ;;  %s2560_s13 = sphi %s2681_s13, %s3170_s13  }
   0xa   : > { %3148 = sst [smem:[#allocation7_spill]] %s2564_s14  ;;  %s2068_s22 = sadd.s32 4294967294, %s2588_s20  }
   0xb   : > { %3149 = sst [smem:[#allocation8_spill]] %s2568_s15  ;;  %s32_s23 = sadd.s32 1, %s2580_s18 }
   0xc   : > { %3150 = sst [smem:[#allocation9_spill]] %s2580_s18  ;;  %p33_p0 = scmp.ge.s32.totalorder %s32_s23, 2 }
   0xd   : > { %3151 = sst [smem:[#allocation10_spill]] %s2584_s19  ;;  %s35_s24 = sadd.s32 1, %s2584_s19 }
   0xe   : > { %3152 = sst [smem:[#allocation11_spill]] %s2588_s20  ;;  %p302_p1 = scmp.ne.s32.totalorder %s2568_s15, %s2564_s14 }
   0xf   : > { %p303_p2 = scmp.eq.s32.totalorder %s2067_s21, 3  ;;  %s3178_s23 = smov (%p33_p0, %s32_s23), 0 }
  0x10   : > { %3153 = sst [smem:[#allocation12_spill]] %s3178_s23  ;;  %s3180_s24 = smov (!%p33_p0, %s35_s24), %s2584_s19 }
  0x11   : > { %p2730_p3 = por %p303_p2, %p302_p1  ;;  %p308_p4 = scmp.ne.s32.totalorder %s2564_s14, %s2560_s13 }
  0x12   : > { %p37_p5 = scmp.ge.s32.totalorder %s3180_s24, 2  ;;  %p309_p6 = scmp.eq.s32.totalorder %s2068_s22, 3 }
  0x13   : > { %s3154_s25 = scalar_select %p2730_p3, 1, 0 }
  0x14   : > { %p2071_p7 = scmp.ge.s32.totalorder %s2588_s20, 1  ;;  %p392_p8 = scmp.lt.s32.totalorder %s2588_s20, 5 }
  0x15   : > { %3155 = sst [smem:[#allocation13_spill]] %s3154_s25  ;;  %s3182_s24 = smov (%p37_p5, %s3180_s24), 0 }
  0x16   : > { %3156 = sst [smem:[#allocation14_spill]] %s3182_s24  ;;  %p2740_p9 = por %p309_p6, %p308_p4 }
  0x17   : > { %p393_p10 = pnand %p2071_p7, %p392_p8  ;;  %s289_s27 = ssub.s32 %s2584_s19, %s3182_s24 }
  0x18   : > { %s3157_s26 = scalar_select %p2740_p9, 1, 0 }
  0x19   : > { %s292_s28 = sadd.s32 1, %s2568_s15  ;;  %p290_p11 = scmp.eq.s32.totalorder %s289_s27, 0 }
  0x1a   : > { %3158 = sst [smem:[#allocation15_spill]] %s3157_s26  ;;  %396 = sbr.rel (%p393_p10) target bundleno = 3030 (0xbd6), region = 60 }
  0x1b   : > { %s2748_s29 = scalar_select %p290_p11, %s2568_s15, %s292_s28  }
  0x1c   : > { %s3133_s30 = sand.u32 (!%p393_p10), 1, %s2564_s14   ;;  %p460_p12 = scmp.lt.s32.totalorder (!%p393_p10), %s2576_s17, 1 }
  0x1d   : > { %3159 = sst [smem:[#allocation16_spill]] %s2748_s29  ;;  %s2754_s11 = sshll.u32 (!%p393_p10), %s3133_s30, 2 }
  0x1e   : > { %p467_p13 = scmp.lt.s32.totalorder (!%p393_p10), %s2572_s16, 1  ;;  %s3160_s0 = sld [smem:[#allocation17_spill]] (!%p393_p10) }
  0x1f   : > { %s3161_s4 = sld [smem:[#allocation18_spill]] (!%p393_p10)  ;;  %p2084_p0 = scmp.ne.s32.totalorder (!%p393_p10), %s2572_s16, 0 }
  0x21   : > { %s2758_s12 = scalar_select %p460_p12, %s2576_s17, 1 }
  0x22   : > { %s2761_s21 = scalar_select %p467_p13, %s2572_s16, 1 }
  0x23   : > { %s2073_s22 = sshll.u32 %s2758_s12, 3  ;;  %499 = sbr.rel (%p2084_p0) target bundleno = 275 (0x113), region = 64  ;;  %v2442_v0 = vld [vmem:[%s3122_s2] sm:$0xff] (!%p2084_p0)   ;;  %v2590_v1 = vmov (!%p2084_p0), 0.0   ;;  %v2443_v2 = vld [vmem:[%s3122_s2 + $0x8] sm:$0xff] (!%p2084_p0)   ;;  %vm2591_vm0 = vmmov (!%p2084_p0), 0  }
  0x24   : > { %s2771_s30 = scalar_lea.vmem %s3160_s0, %s2073_s22  ;;  %s2130_s18 = sshll.u32 %s2761_s21, 4  ;;  %2188 = vmatprep.subr.bf16.mxu0 (!%p2084_p0), %v2590_v1  ;;  %2200 = vmatprep.mubr.msk.bf16.mxu0 (!%p2084_p0), %vm2591_vm0, %v2590_v1  ;;  %v2444_v3 = vld [vmem:[%s3122_s2 + $0x10] sm:$0xff] (!%p2084_p0)   ;;  %v2445_v4 = vld [vmem:[%s3122_s2 + $0x18] sm:$0xff] (!%p2084_p0)   ;;  %v2446_v5 = vld [vmem:[%s3122_s2 + $0x20] sm:$0xff] (!%p2084_p0)   ;;  %vm550_vm1 = vcmask (!%p2084_p0), 785408   ;;  %vm596_vm2 = vcmask (!%p2084_p0), 261120  }
  0x25   : > { %s2777_s26 = scalar_lea.vmem %s3161_s4, %s2130_s18  ;;  %s2782_s10 = scalar_lea.vmem %s3125_s5, %s2130_s18  ;;  %2189 = vmatpush3.bf16.msra.mxu0 (!%p2084_p0), %v2442_v0  ;;  %v2447_v6 = vld [vmem:[%s3122_s2 + $0x28] sm:$0xff] (!%p2084_p0)   ;;  %v500_v7 = vld [vmem:[%s2771_s30] sm:$0xff] (!%p2084_p0) }
  0x26   : > { %s2787_s27 = scalar_lea.vmem %s3126_s6, %s2130_s18  ;;  %s2133_s28 = sshll.u32 %s2761_s21, 5  ;;  %2190 = vmatprep.subr.bf16.mxu0 (!%p2084_p0), %v2590_v1  ;;  %v501_v8 = vpack.c.bf16 (!%p2084_p0), %v500_v7, %v500_v7  ;;  %v594_v9 = vld [vmem:[%s3123_s3] sm:$0xff] (!%p2084_p0) }
  0x27   : > { %s2793_s22 = scalar_lea.vmem %s3127_s7, %s2133_s28  ;;  %s2798_s29 = scalar_lea.vmem %s3128_s8, %s2130_s18 }
  0x28   : > { %s494_s20 = scalar_lea.vmem %s3129_s9, %s2761_s21  ;;  %s459_s4 = scalar_lea.vmem [#allocation3], %s2754_s11 }
  0x29   : > { %2191 = vmatpush3.bf16.msra.mxu0 (!%p2084_p0), %v2443_v2 }
  0x2a   : > { %2192 = vmatprep.subr.bf16.mxu0 %v2590_v1 }
  0x2d   : > { %2193 = vmatpush3.bf16.msra.mxu0 %v2444_v3 }
  0x2e   : > { %2194 = vmatprep.subr.bf16.mxu0 %v2590_v1 }
  0x31   : > { %2195 = vmatpush3.bf16.msra.mxu0 %v2445_v4 }
  0x32   : > { %2196 = vmatprep.subr.bf16.mxu0 %v2590_v1 }
  0x35   : > { %2197 = vmatpush3.bf16.msra.mxu0 %v2446_v5 }
  0x36   : > { %2198 = vmatprep.subr.bf16.mxu0 %v2590_v1 }
  0x39   : > { %2199 = vmatpush3.bf16.msra.mxu0 %v2447_v6 }
  0x3c   : > { %2201 = vmatmul.mubr.msk.bf16.vlgmr.msra.gmra.mrb[0].mxu0 %vm550_vm1, %v501_v8 }
 0x10f   : > { %v588_v10 = vpop.f32.mrb[0].mxu0 }
 0x110   : > { %v595_v11 = vadd.f32 %v594_v9, %v588_v10  ;;  %v2202_v12 = vpop.f32.mrb[1].mxu0 }
 0x111   : > { %v591_v13 = vpop.f32.mrb[2].mxu0 }
 0x112   : > { %597 = vst.msk [vmem:[#allocation2] sm:$0xff] %vm596_vm2, %v595_v11  ;;  %v2203_v14 = vpop.f32.mrb[3].mxu0 }
 0x113 PF: > { %v2448_v15 = vld [vmem:[%s2777_s26] sm:$0xff]   ;;  %v662_v16 = vlaneseq  ;;  %v2592_v17 = vmov 0.0   ;;  %v2449_v18 = vld [vmem:[%s2777_s26 + $0x8] sm:$0xff]   ;;  %vm2593_vm3 = vmmov 0   ;;  %vm618_vm4 = vcmask 261120   ;;  %s2594_s26 = smov 32  }
 0x114   : > { %2204 = vmatprep.subr.bf16.mxu0 %v2592_v17  ;;  %2212 = vmatprep.subr.bf16.mxu1 %v2592_v17  ;;  %v2837_v20 = vld [vmem:[%s2798_s29] sm:$0xff]  ;;  %s2595_s30 = smov 92   ;;  %s2596_s0 = smov 96   ;;  %vm692_vm5 = vcmask 31744   ;;  %vm747_vm6 = vcmask 64512   ;;  %vm766_vm7 = vcmask 1043456  }
 0x115   : > { %2205 = vmatpush3.bf16.msra.mxu0 %v2448_v15  ;;  %2208 = vmatprep.mubr.msk.bf16.mxu0 %vm2593_vm3, %v2592_v17  ;;  %v2839_v21 = vshrl.u32 %v662_v16, 7  ;;  %s2597_s18 = smov 88   ;;  %s2598_s24 = smov 124   ;;  %vm1625_vm8 = vcmask 97280   ;;  %vm1627_vm9 = vcmask 130048   ;;  %vm1629_vm10 = vcmask 162816  }
 0x116   : > { %2206 = vmatprep.subr.bf16.mxu0 %v2592_v17  ;;  %2214 = vmatprep.mubr.msk.bf16.mxu1 %vm2593_vm3, %v2592_v17  ;;  %s2599_s23 = smov 84   ;;  %s2600_s15 = smov 120   ;;  %vm1631_vm11 = vcmask 195584   ;;  %vm1633_vm12 = vcmask 228352   ;;  %vm1829_vm13 = vcmask 523264  }
 0x117   : > { %v669_v22 = vsub.s32 1, %v2839_v21  ;;  %v664_v25 = vsub.s32 0, %v2839_v21  ;;  %s2601_s13 = smov 80   ;;  %s2602_s14 = smov 116  }
 0x118   : > { %s2603_s25 = smov 76   ;;  %s2604_s28 = smov 112  }
 0x119   : > { %v2834_v19 = vld [vmem:[#allocation2] sm:$0xff]  ;;  %2207 = vmatpush3.bf16.msra.mxu0 %v2449_v18  ;;  %v670_v24 = vrot.slane %v2837_v20, %v669_v22  ;;  %v665_v27 = vrot.slane %v2837_v20, %v664_v25  ;;  %s2605_s19 = smov 72   ;;  %p2125_p1 = scmp.ne.s32.totalorder %s2572_s16, 1 }
 0x11a   : > { %v599_v23 = vpack.c.bf16 %v2834_v19, %v2834_v19  ;;  %2218 = vmatprep.subr.bf16.mxu0 %v2592_v17  ;;  %vm1903_vm14 = vcmask (!%p2125_p1), 257024  }
 0x11b   : > { %672 = vrot.lane.b32.xlu0 %v670_v24, %s2594_s26  ;;  %s2606_s26 = smov 108  }
 0x11c   : > { %2209 = vmatmul.mubr.msk.bf16.vlgmr.msra.gmra.mrb[0].mxu0 %vm618_vm4, %v599_v23 }
 0x11d   : > { %2220 = vmatprep.mubr.msk.bf16.mxu0 %vm2593_vm3, %v2592_v17 }
 0x18d   : > { %v673_v26 = vpop.permute.xlu0 %672 }
 0x1ef   : > { %v2854_v28 = vpop.f32.mrb[0].mxu0 }
 0x1f0   : > { %v675_v29 = vadd.f32 %v673_v26, %v2854_v28  ;;  %v2210_v30 = vpop.f32.mrb[1].mxu0  ;;  %v666_v32 = vadd.f32 %v665_v27, %v2854_v28 }
 0x1f1   : > { %v659_v31 = vpop.f32.mrb[2].mxu0 }
 0x1f2   : > { %v687_v33 = vpack.c.bf16 %v675_v29, %v675_v29  ;;  %v2211_v34 = vpop.f32.mrb[3].mxu0  ;;  %v686_v35 = vpack.c.bf16 %v666_v32, %v666_v32 }
 0x1f4   : > { %813 = vrot.lane.b32.xlu1 %v687_v33, %s2595_s30  ;;  %690 = vrot.lane.b32.xlu0 %v687_v33, %s2596_s0  ;;  %s2607_s30 = smov 68   ;;  %s2608_s0 = smov 104  }
 0x1f8   : > { %925 = vrot.lane.b32.xlu0 %v687_v33, %s2597_s18  ;;  %811 = vrot.lane.b32.xlu1 %v686_v35, %s2598_s24  ;;  %s2609_s18 = smov 100   ;;  %s2620_s24 = smov 12  }
 0x1fc   : > { %1037 = vrot.lane.b32.xlu0 %v687_v33, %s2599_s23  ;;  %923 = vrot.lane.b32.xlu1 %v686_v35, %s2600_s15  ;;  %s3162_s15 = scalar_lea.vmem %s3121_s1, %s2758_s12  ;;  %s2610_s12 = smov 64  }
 0x1fd   : > { %v2096_v60 = vld [vmem:[%s3162_s15] ss:$0 sm:$0xff]  ;;  %s2621_s23 = smov 16   ;;  %s2622_s15 = smov 20  }
 0x200   : > { %1149 = vrot.lane.b32.xlu0 %v687_v33, %s2601_s13  ;;  %1035 = vrot.lane.b32.xlu1 %v686_v35, %s2602_s14  ;;  %s2611_s13 = smov 56   ;;  %s2612_s14 = smov 48  }
 0x204   : > { %1261 = vrot.lane.b32.xlu0 %v687_v33, %s2603_s25  ;;  %1147 = vrot.lane.b32.xlu1 %v686_v35, %s2604_s28  ;;  %s2613_s25 = smov 60   ;;  %s2614_s28 = smov 52  }
 0x208   : > { %1373 = vrot.lane.b32.xlu0 %v687_v33, %s2605_s19  ;;  %1259 = vrot.lane.b32.xlu1 %v686_v35, %s2606_s26  ;;  %s2615_s19 = smov 40   ;;  %s2616_s26 = smov 44  }
 0x20c   : > { %1485 = vrot.lane.b32.xlu0 %v687_v33, %s2607_s30  ;;  %1371 = vrot.lane.b32.xlu1 %v686_v35, %s2608_s0  ;;  %s2617_s30 = smov 36   ;;  %s2618_s0 = smov 4  }
 0x210   : > { %1483 = vrot.lane.b32.xlu1 %v686_v35, %s2609_s18  ;;  %s2619_s18 = smov 8  }
 0x266   : > { %v691_v36 = vpop.permute.xlu0 %690  ;;  %v814_v38 = vpop.permute.xlu1 %813 }
 0x267   : > { %v697_v37 = vsel %vm692_vm5, %v691_v36, 0  ;;  %v819_v39 = vsel %vm692_vm5, %v814_v38, 0 }
 0x268   : > { %2213 = vmatpush3.bf16.xpose.msra.mxu1 %v697_v37 }
 0x269   : > { %2224 = vmatprep.subr.bf16.mxu1 %v2592_v17 }
 0x26a   : > { %v926_v40 = vpop.permute.xlu0 %925  ;;  %v812_v41 = vpop.permute.xlu1 %811 }
 0x26b   : > { %v931_v42 = vsel %vm692_vm5, %v926_v40, 0 }
 0x26e   : > { %v1038_v43 = vpop.permute.xlu0 %1037  ;;  %v924_v44 = vpop.permute.xlu1 %923 }
 0x26f   : > { %2215 = vmatmul.mubr.msk.bf16.vlgmr.msra.gmra.mrb[0].mxu1 %vm692_vm5, %v686_v35  ;;  %v1043_v45 = vsel %vm692_vm5, %v1038_v43, 0 }
 0x270   : > { %2225 = vmatpush3.bf16.xpose.msra.mxu1 %v819_v39  ;;  %2226 = vmatprep.mubr.msk.bf16.mxu1 %vm2593_vm3, %v2592_v17 }
 0x271   : > { %2236 = vmatprep.subr.bf16.mxu1 %v2592_v17 }
 0x272   : > { %v1150_v46 = vpop.permute.xlu0 %1149  ;;  %v1036_v47 = vpop.permute.xlu1 %1035 }
 0x273   : > { %v1155_v48 = vsel %vm692_vm5, %v1150_v46, 0 }
 0x276   : > { %v1262_v49 = vpop.permute.xlu0 %1261  ;;  %v1148_v50 = vpop.permute.xlu1 %1147 }
 0x277   : > { %2227 = vmatmul.mubr.msk.bf16.vlgmr.msra.gmra.mrb[4].mxu1 %vm692_vm5, %v812_v41  ;;  %v1267_v51 = vsel %vm692_vm5, %v1262_v49, 0 }
 0x278   : > { %2237 = vmatpush3.bf16.xpose.msra.mxu1 %v931_v42  ;;  %2238 = vmatprep.mubr.msk.bf16.mxu1 %vm2593_vm3, %v2592_v17 }
 0x279   : > { %2248 = vmatprep.subr.bf16.mxu1 %v2592_v17 }
 0x27a   : > { %v1374_v52 = vpop.permute.xlu0 %1373  ;;  %v1260_v53 = vpop.permute.xlu1 %1259 }
 0x27b   : > { %v1379_v54 = vsel %vm692_vm5, %v1374_v52, 0 }
 0x27e   : > { %v1486_v55 = vpop.permute.xlu0 %1485  ;;  %v1372_v56 = vpop.permute.xlu1 %1371 }
 0x27f   : > { %2239 = vmatmul.mubr.msk.bf16.vlgmr.msra.gmra.mrb[8].mxu1 %vm692_vm5, %v924_v44  ;;  %v1491_v57 = vsel %vm692_vm5, %v1486_v55, 0  ;;  %v678_v55 = vsub.s32 2, %v2839_v21 }
 0x280   : > { %2249 = vmatpush3.bf16.xpose.msra.mxu1 %v1043_v45  ;;  %2250 = vmatprep.mubr.msk.bf16.mxu1 %vm2593_vm3, %v2592_v17 }
 0x281   : > { %2260 = vmatprep.subr.bf16.mxu1 %v2592_v17 }
 0x282   : > { %v1484_v58 = vpop.permute.xlu1 %1483 }
 0x287   : > { %2251 = vmatmul.mubr.msk.bf16.vlgmr.msra.gmra.mrb[12].mxu1 %vm692_vm5, %v1036_v47 }
 0x288   : > { %2261 = vmatpush3.bf16.xpose.msra.mxu1 %v1155_v48  ;;  %2262 = vmatprep.mubr.msk.bf16.mxu1 %vm2593_vm3, %v2592_v17 }
 0x289   : > { %2272 = vmatprep.subr.bf16.mxu1 %v2592_v17 }
 0x28f   : > { %2263 = vmatmul.mubr.msk.bf16.vlgmr.msra.gmra.mrb[16].mxu1 %vm692_vm5, %v1148_v50 }
 0x290   : > { %2273 = vmatpush3.bf16.xpose.msra.mxu1 %v1267_v51  ;;  %2274 = vmatprep.mubr.msk.bf16.mxu1 %vm2593_vm3, %v2592_v17 }
 0x291   : > { %2284 = vmatprep.subr.bf16.mxu1 %v2592_v17 }
 0x297   : > { %2275 = vmatmul.mubr.msk.bf16.vlgmr.msra.gmra.mrb[20].mxu1 %vm692_vm5, %v1260_v53 }
 0x298   : > { %2285 = vmatpush3.bf16.xpose.msra.mxu1 %v1379_v54  ;;  %2286 = vmatprep.mubr.msk.bf16.mxu1 %vm2593_vm3, %v2592_v17 }
 0x299   : > { %2296 = vmatprep.subr.bf16.mxu1 %v2592_v17 }
 0x29f   : > { %2287 = vmatmul.mubr.msk.bf16.vlgmr.msra.gmra.mrb[24].mxu1 %vm692_vm5, %v1372_v56  ;;  %v679_v56 = vrot.slane %v2837_v20, %v678_v55 }
 0x2a0   : > { %2297 = vmatpush3.bf16.xpose.msra.mxu1 %v1491_v57  ;;  %2298 = vmatprep.mubr.msk.bf16.mxu1 %vm2593_vm3, %v2592_v17 }
 0x2a1   : > { %2308 = vmatprep.subr.bf16.mxu1 %v2592_v17 }
 0x2a7   : > { %2299 = vmatmul.mubr.msk.bf16.vlgmr.msra.gmra.mrb[28].mxu1 %vm692_vm5, %v1484_v58 }
 0x2a8   : > { %2312 = vmatprep.mubr.msk.bf16.mxu1 %vm2593_vm3, %v2592_v17 }
 0x342   : > { %v733_v59 = vpop.f32.mrb[0].mxu1 }
 0x343   : > { %v739_v61 = vmul.f32 0.5, %v733_v59  ;;  %v2216_v62 = vpop.f32.mrb[1].mxu1 }
 0x344   : > { %v736_v63 = vpop.f32.mrb[2].mxu1 }
 0x345   : > { %v2217_v0 = vpop.f32.mrb[3].mxu1  ;;  %v2903_v1 = vadd.f32 %v2096_v60, %v739_v61 }
 0x347   : > { %v748_v2 = vsel %vm747_vm6, %v2903_v1, -inf }
 0x348   : > { %749 = vmax.xlane.f32.xlu0 %v748_v2 }
 0x34a   : > { %v855_v3 = vpop.f32.mrb[4].mxu1 }
 0x34b   : > { %v861_v4 = vmul.f32 0.5, %v855_v3  ;;  %v2228_v5 = vpop.f32.mrb[5].mxu1 }
 0x34c   : > { %v858_v6 = vpop.f32.mrb[6].mxu1 }
 0x34d   : > { %v2229_v7 = vpop.f32.mrb[7].mxu1  ;;  %v2907_v8 = vadd.f32 %v2096_v60, %v861_v4 }
 0x34f   : > { %v863_v9 = vsel %vm747_vm6, %v2907_v8, -inf }
 0x350   : > { %864 = vmax.xlane.f32.xlu1 %v863_v9 }
 0x352   : > { %v967_v10 = vpop.f32.mrb[8].mxu1 }
 0x353   : > { %v973_v11 = vmul.f32 0.5, %v967_v10  ;;  %v2240_v12 = vpop.f32.mrb[9].mxu1 }
 0x354   : > { %v970_v13 = vpop.f32.mrb[10].mxu1 }
 0x355   : > { %v2241_v14 = vpop.f32.mrb[11].mxu1  ;;  %v2911_v15 = vadd.f32 %v2096_v60, %v973_v11 }
 0x357   : > { %v975_v16 = vsel %vm747_vm6, %v2911_v15, -inf }
 0x358   : > { %976 = vmax.xlane.f32.xlu0 %v975_v16 }
 0x35a   : > { %v1079_v18 = vpop.f32.mrb[12].mxu1 }
 0x35b   : > { %v1085_v22 = vmul.f32 0.5, %v1079_v18  ;;  %v2252_v23 = vpop.f32.mrb[13].mxu1 }
 0x35c   : > { %v1082_v24 = vpop.f32.mrb[14].mxu1 }
 0x35d   : > { %v2253_v25 = vpop.f32.mrb[15].mxu1  ;;  %v2915_v26 = vadd.f32 %v2096_v60, %v1085_v22 }
 0x35f   : > { %v1087_v27 = vsel %vm747_vm6, %v2915_v26, -inf }
 0x360   : > { %1088 = vmax.xlane.f32.xlu0 %v1087_v27 }
 0x362   : > { %v1191_v29 = vpop.f32.mrb[16].mxu1 }
 0x363   : > { %v1197_v30 = vmul.f32 0.5, %v1191_v29  ;;  %v2264_v31 = vpop.f32.mrb[17].mxu1 }
 0x364   : > { %v1194_v32 = vpop.f32.mrb[18].mxu1 }
 0x365   : > { %v2265_v33 = vpop.f32.mrb[19].mxu1  ;;  %v1198_v34 = vadd.f32 %v2096_v60, %v1197_v30 }
 0x367   : > { %v1199_v35 = vsel %vm747_vm6, %v1198_v34, -inf }
 0x368   : > { %1200 = vmax.xlane.f32.xlu1 %v1199_v35 }
 0x36a   : > { %v1303_v36 = vpop.f32.mrb[20].mxu1 }
 0x36b   : > { %v1309_v37 = vmul.f32 0.5, %v1303_v36  ;;  %v2276_v38 = vpop.f32.mrb[21].mxu1 }
 0x36c   : > { %v1306_v39 = vpop.f32.mrb[22].mxu1 }
 0x36d   : > { %v2277_v40 = vpop.f32.mrb[23].mxu1  ;;  %v2920_v41 = vadd.f32 %v2096_v60, %v1309_v37 }
 0x36f   : > { %v1311_v42 = vsel %vm747_vm6, %v2920_v41, -inf }
 0x370   : > { %1312 = vmax.xlane.f32.xlu0 %v1311_v42 }
 0x372   : > { %v1415_v43 = vpop.f32.mrb[24].mxu1 }
 0x373   : > { %v1421_v44 = vmul.f32 0.5, %v1415_v43  ;;  %v2288_v45 = vpop.f32.mrb[25].mxu1 }
 0x374   : > { %v1418_v46 = vpop.f32.mrb[26].mxu1 }
 0x375   : > { %v2289_v47 = vpop.f32.mrb[27].mxu1  ;;  %v2924_v48 = vadd.f32 %v2096_v60, %v1421_v44 }
 0x37a   : > { %v1527_v49 = vpop.f32.mrb[28].mxu1 }
 0x37b   : > { %v1533_v50 = vmul.f32 0.5, %v1527_v49  ;;  %v2300_v51 = vpop.f32.mrb[29].mxu1 }
 0x37c   : > { %v1530_v52 = vpop.f32.mrb[30].mxu1 }
 0x37d   : > { %v2301_v53 = vpop.f32.mrb[31].mxu1  ;;  %v2926_v54 = vadd.f32 %v2096_v60, %v1533_v50 }
 0x37f   : > { %v1535_v14 = vsel %vm747_vm6, %v2926_v54, -inf }
 0x386   : > { %681 = vrot.lane.b32.xlu0 %v679_v56, %s2610_s12 }
 0x3d5   : > { %v750_v57 = vpop.xlane.xlu0 %749 }
 0x3dd   : > { %v865_v60 = vpop.xlane.xlu1 %864 }
 0x3de   : > { %v866_v6 = vsub.f32 %v2907_v8, %v865_v60 }
 0x3e0   : > { %v867_v9 = vmul.f32 1.442695, %v866_v6 }
 0x3e5   : > { %v977_v58 = vpop.xlane.xlu0 %976 }
 0x3e6   : > { %v978_v10 = vsub.f32 %v2911_v15, %v977_v58 }
 0x3e8   : > { %v979_v12 = vmul.f32 1.442695, %v978_v10 }
 0x3ed   : > { %v1089_v59 = vpop.xlane.xlu0 %1088 }
 0x3ee   : > { %v1090_v13 = vsub.f32 %v2915_v26, %v1089_v59 }
 0x3f0   : > { %v1091_v8 = vmul.f32 1.442695, %v1090_v13 }
 0x3f5   : > { %v1201_v2 = vpop.xlane.xlu1 %1200 }
 0x3f6   : > { %v1202_v3 = vsub.f32 %v1198_v34, %v1201_v2 }
 0x3f8   : > { %v1203_v4 = vmul.f32 1.442695, %v1202_v3 }
 0x3fa   : > { %2458 = vpow2.f32 %v1203_v4 }
 0x3fd   : > { %v1313_v61 = vpop.xlane.xlu0 %1312 }
 0x3fe   : > { %v1314_v27 = vsub.f32 %v2920_v41, %v1313_v61 }
 0x400   : > { %v1315_v29 = vmul.f32 1.442695, %v1314_v27 }
 0x401   : > { %v682_v62 = vpop.permute.xlu0 %681 }
 0x402   : > { %v684_v63 = vadd.f32 %v682_v62, %v2854_v28  ;;  %v751_v28 = vsub.f32 %v2903_v1, %v750_v57  ;;  %v1423_v1 = vsel %vm747_vm6, %v2924_v48, -inf }
 0x404   : > { %v2931_v0 = vpack.c.bf16 %v684_v63, %v684_v63  ;;  %v752_v5 = vmul.f32 1.442695, %v751_v28  ;;  %v2939_v7 = vpop.eup %2458 }
 0x405   : > { %v1205_v11 = vsel %vm747_vm6, %v2939_v7, 0.0 }
 0x406   : > { %987 = vrot.lane.b32.xlu0 %v2931_v0, %s2611_s13  ;;  %761 = vrot.lane.b32.xlu1 %v2931_v0, %s2610_s12  ;;  %2460 = vpow2.f32 %v752_v5  ;;  %s2623_s12 = smov 24   ;;  %s2624_s13 = smov 28  }
 0x407   : > { %2462 = vpow2.f32 %v867_v9 }
 0x408   : > { %2464 = vpow2.f32 %v979_v12 }
 0x409   : > { %2466 = vpow2.f32 %v1091_v8 }
 0x40a   : > { %1211 = vrot.lane.b32.xlu0 %v2931_v0, %s2612_s14  ;;  %875 = vrot.lane.b32.xlu1 %v2931_v0, %s2613_s25  ;;  %2468 = vpow2.f32 %v1315_v29 }
 0x410   : > { %v2461_v16 = vpop.eup %2460 }
 0x411   : > { %v754_v15 = vsel %vm747_vm6, %v2461_v16, 0.0  ;;  %v2463_v18 = vpop.eup %2462 }
 0x412   : > { %v869_v22 = vsel %vm747_vm6, %v2463_v18, 0.0  ;;  %v2465_v23 = vpop.eup %2464 }
 0x413   : > { %v981_v24 = vsel %vm747_vm6, %v2465_v23, 0.0  ;;  %v2952_v25 = vpop.eup %2466 }
 0x414   : > { %v1093_v26 = vsel %vm747_vm6, %v2952_v25, 0.0  ;;  %v2958_v30 = vpop.eup %2468 }
 0x415   : > { %v1317_v31 = vsel %vm747_vm6, %v2958_v30, 0.0 }
 0x429   : > { %1206 = vadd.xlane.f32.xlu0 %v1205_v11 }
 0x42e   : > { %1424 = vmax.xlane.f32.xlu1 %v1423_v1 }
 0x432   : > { %1536 = vmax.xlane.f32.xlu1 %v1535_v14 }
 0x436   : > { %755 = vadd.xlane.f32.xlu1 %v754_v15 }
 0x43a   : > { %870 = vadd.xlane.f32.xlu1 %v869_v22 }
 0x43e   : > { %982 = vadd.xlane.f32.xlu1 %v981_v24 }
 0x442   : > { %1094 = vadd.xlane.f32.xlu1 %v1093_v26 }
 0x453   : > { %1099 = vrot.lane.b32.xlu1 %v2931_v0, %s2614_s28 }
 0x477   : > { %1318 = vadd.xlane.f32.xlu1 %v1317_v31 }
 0x478   : > { %v762_v32 = vpop.permute.xlu1 %761  ;;  %v988_v52 = vpop.permute.xlu0 %987 }
 0x479   : > { %v768_v33 = vsel %vm766_vm7, %v762_v32, 0  ;;  %v993_v59 = vsel %vm766_vm7, %v988_v52, 0 }
 0x47a   : > { %2219 = vmatpush3.bf16.msra.mxu0 %v768_v33 }
 0x47b   : > { %2230 = vmatprep.subr.bf16.mxu0 %v2592_v17 }
 0x47c   : > { %v876_v34 = vpop.permute.xlu1 %875  ;;  %v1212_v56 = vpop.permute.xlu0 %1211 }
 0x47d   : > { %v881_v53 = vsel %vm766_vm7, %v876_v34, 0  ;;  %v1217_v6 = vsel %vm766_vm7, %v1212_v56, 0 }
 0x4b6   : > { %v1207_v61 = vpop.xlane.xlu0 %1206 }
 0x4bb   : > { %v1425_v35 = vpop.xlane.xlu1 %1424 }
 0x4bc   : > { %v1426_v36 = vsub.f32 %v2924_v48, %v1425_v35 }
 0x4be   : > { %v1427_v37 = vmul.f32 1.442695, %v1426_v36 }
 0x4bf   : > { %v1537_v38 = vpop.xlane.xlu1 %1536 }
 0x4c0   : > { %2470 = vpow2.f32 %v1427_v37  ;;  %v1538_v39 = vsub.f32 %v2926_v54, %v1537_v38 }
 0x4c2   : > { %v1539_v40 = vmul.f32 1.442695, %v1538_v39 }
 0x4c3   : > { %v756_v41 = vpop.xlane.xlu1 %755 }
 0x4c4   : > { %2472 = vpow2.f32 %v1539_v40 }
 0x4c5   : > { %2474 = vrcp.f32 %v756_v41 }
 0x4c7   : > { %v871_v42 = vpop.xlane.xlu1 %870 }
 0x4c8   : > { %2476 = vrcp.f32 %v871_v42 }
 0x4ca   : > { %v2966_v43 = vpop.eup %2470 }
 0x4cb   : > { %v1429_v44 = vsel %vm747_vm6, %v2966_v43, 0.0  ;;  %v983_v46 = vpop.xlane.xlu1 %982 }
 0x4cc   : > { %1430 = vadd.xlane.f32.xlu0 %v1429_v44  ;;  %2478 = vrcp.f32 %v983_v46 }
 0x4ce   : > { %v2970_v45 = vpop.eup %2472 }
 0x4cf   : > { %v2475_v47 = vpop.eup %2474  ;;  %v1541_v48 = vsel %vm747_vm6, %v2970_v45, 0.0  ;;  %v1095_v55 = vpop.xlane.xlu1 %1094 }
 0x4d0   : > { %v758_v49 = vmul.f32 %v2475_v47, %v2461_v16  ;;  %1542 = vadd.xlane.f32.xlu1 %v1541_v48  ;;  %2480 = vrcp.f32 %v1095_v55  ;;  %v2451_v55 = vld [vmem:[%s2782_s10 + $0x8] sm:$0xff]  }
 0x4d1   : > { %2482 = vrcp.f32 %v1207_v61 }
 0x4d2   : > { %v759_v50 = vpack.c.bf16 %v758_v49, %v758_v49  ;;  %v2477_v51 = vpop.eup %2476 }
 0x4d3   : > { %v873_v54 = vmul.f32 %v2477_v51, %v2463_v18  ;;  %v1100_v63 = vpop.permute.xlu1 %1099 }
 0x4d4   : > { %2221 = vmatmul.mubr.msk.bf16.vlgmr.msra.gmra.mrb[4].mxu0 %vm747_vm6, %v759_v50  ;;  %v1105_v3 = vsel %vm766_vm7, %v1100_v63, 0  ;;  %v2450_v50 = vld [vmem:[%s2782_s10] sm:$0xff]  }
 0x4d5   : > { %2231 = vmatpush3.bf16.msra.mxu0 %v881_v53  ;;  %2232 = vmatprep.mubr.msk.bf16.mxu0 %vm2593_vm3, %v2592_v17  ;;  %v874_v57 = vpack.c.bf16 %v873_v54, %v873_v54 }
 0x4d6   : > { %2242 = vmatprep.subr.bf16.mxu0 %v2592_v17  ;;  %v2479_v58 = vpop.eup %2478  ;;  %2309 = vmatpush3.bf16.msra.mxu1 %v2450_v50  ;;  %v2115_v50 = vld [vmem:[%s494_s20] ss:$0 sm:$0xff] }
 0x4d7   : > { %v985_v62 = vmul.f32 %v2479_v58, %v2465_v23  ;;  %2310 = vmatprep.subr.bf16.mxu1 %v2592_v17 }
 0x4d9   : > { %v986_v60 = vpack.c.bf16 %v985_v62, %v985_v62 }
 0x4da   : > { %v2481_v2 = vpop.eup %2480  ;;  %2311 = vmatpush3.bf16.msra.mxu1 %v2451_v55 }
 0x4db   : > { %v1097_v4 = vmul.f32 %v2481_v2, %v2952_v25  ;;  %v2483_v5 = vpop.eup %2482  ;;  %2324 = vmatprep.subr.bf16.mxu1 %v2592_v17 }
 0x4dc   : > { %2233 = vmatmul.mubr.msk.bf16.vlgmr.msra.gmra.mrb[8].mxu0 %vm747_vm6, %v874_v57  ;;  %v1209_v9 = vmul.f32 %v2483_v5, %v2939_v7 }
 0x4dd   : > { %2243 = vmatpush3.bf16.msra.mxu0 %v993_v59  ;;  %2244 = vmatprep.mubr.msk.bf16.mxu0 %vm2593_vm3, %v2592_v17  ;;  %v1098_v28 = vpack.c.bf16 %v1097_v4, %v1097_v4 }
 0x4de   : > { %2254 = vmatprep.subr.bf16.mxu0 %v2592_v17  ;;  %v1210_v10 = vpack.c.bf16 %v1209_v9, %v1209_v9 }
 0x4e1   : > { %1435 = vrot.lane.b32.xlu1 %v2931_v0, %s2615_s19 }
 0x4e2   : > { %1323 = vrot.lane.b32.xlu0 %v2931_v0, %s2616_s26 }
 0x4e4   : > { %2245 = vmatmul.mubr.msk.bf16.vlgmr.msra.gmra.mrb[12].mxu0 %vm747_vm6, %v986_v60 }
 0x4e5   : > { %2255 = vmatpush3.bf16.msra.mxu0 %v1105_v3  ;;  %2256 = vmatprep.mubr.msk.bf16.mxu0 %vm2593_vm3, %v2592_v17 }
 0x4e6   : > { %1547 = vrot.lane.b32.xlu0 %v2931_v0, %s2617_s30  ;;  %2266 = vmatprep.subr.bf16.mxu0 %v2592_v17 }
 0x4ec   : > { %2257 = vmatmul.mubr.msk.bf16.vlgmr.msra.gmra.mrb[16].mxu0 %vm747_vm6, %v1098_v28 }
 0x4ed   : > { %2267 = vmatpush3.bf16.msra.mxu0 %v1217_v6  ;;  %2268 = vmatprep.mubr.msk.bf16.mxu0 %vm2593_vm3, %v2592_v17 }
 0x4ee   : > { %2278 = vmatprep.subr.bf16.mxu0 %v2592_v17 }
 0x4f4   : > { %2269 = vmatmul.mubr.msk.bf16.vlgmr.msra.gmra.mrb[20].mxu0 %vm747_vm6, %v1210_v10 }
 0x4f5   : > { %2280 = vmatprep.mubr.msk.bf16.mxu0 %vm2593_vm3, %v2592_v17 }
 0x504   : > { %v1319_v0 = vpop.xlane.xlu1 %1318 }
 0x505   : > { %2484 = vrcp.f32 %v1319_v0 }
 0x50f   : > { %v2485_v11 = vpop.eup %2484 }
 0x510   : > { %v1321_v13 = vmul.f32 %v2485_v11, %v2958_v30 }
 0x512   : > { %v1322_v7 = vpack.c.bf16 %v1321_v13, %v1321_v13 }
 0x559   : > { %v1431_v12 = vpop.xlane.xlu0 %1430 }
 0x55a   : > { %2486 = vrcp.f32 %v1431_v12 }
 0x55d   : > { %v1324_v1 = vpop.permute.xlu0 %1323  ;;  %v1543_v8 = vpop.xlane.xlu1 %1542 }
 0x55e   : > { %v1329_v14 = vsel %vm766_vm7, %v1324_v1, 0  ;;  %2488 = vrcp.f32 %v1543_v8 }
 0x55f   : > { %2279 = vmatpush3.bf16.msra.mxu0 %v1329_v14 }
 0x560   : > { %2290 = vmatprep.subr.bf16.mxu0 %v2592_v17 }
 0x561   : > { %v1436_v16 = vpop.permute.xlu1 %1435  ;;  %v1548_v23 = vpop.permute.xlu0 %1547 }
 0x562   : > { %v1441_v15 = vsel %vm766_vm7, %v1436_v16, 0  ;;  %2281 = vmatmul.mubr.msk.bf16.vlgmr.msra.gmra.mrb[24].mxu0 %vm747_vm6, %v1322_v7  ;;  %v1553_v26 = vsel %vm766_vm7, %v1548_v23, 0  ;;  %v1642_v7 = vsub.s32 3, %v2839_v21 }
 0x563   : > { %2291 = vmatpush3.bf16.msra.mxu0 %v1441_v15  ;;  %2292 = vmatprep.mubr.msk.bf16.mxu0 %vm2593_vm3, %v2592_v17 }
 0x564   : > { %v2487_v18 = vpop.eup %2486  ;;  %2302 = vmatprep.subr.bf16.mxu0 %v2592_v17  ;;  %v1643_v16 = vrot.slane %v2837_v20, %v1642_v7 }
 0x565   : > { %v1433_v22 = vmul.f32 %v2487_v18, %v2966_v43 }
 0x567   : > { %v1434_v24 = vpack.c.bf16 %v1433_v22, %v1433_v22 }
 0x568   : > { %v2489_v25 = vpop.eup %2488 }
 0x569   : > { %v1545_v27 = vmul.f32 %v2489_v25, %v2970_v45 }
 0x56a   : > { %2293 = vmatmul.mubr.msk.bf16.vlgmr.msra.gmra.mrb[28].mxu0 %vm747_vm6, %v1434_v24 }
 0x56b   : > { %2303 = vmatpush3.bf16.msra.mxu0 %v1553_v26  ;;  %2304 = vmatprep.mubr.msk.bf16.mxu0 %vm2593_vm3, %v2592_v17  ;;  %v1546_v29 = vpack.c.bf16 %v1545_v27, %v1545_v27 }
 0x56c   : > { %2316 = vmatprep.subr.bf16.mxu0 %v2592_v17 }
 0x572   : > { %2305 = vmatmul.mubr.msk.bf16.vlgmr.msra.gmra.mrb[32].mxu0 %vm747_vm6, %v1546_v29 }
 0x573   : > { %2320 = vmatprep.mubr.msk.bf16.mxu0 %vm2593_vm3, %v2592_v17 }
 0x5a7   : > { %v804_v30 = vpop.f32.mrb[4].mxu0 }
 0x5a8   : > { %v2222_v31 = vpop.f32.mrb[5].mxu0 }
 0x5a9   : > { %v807_v32 = vpop.f32.mrb[6].mxu0 }
 0x5aa   : > { %v2223_v33 = vpop.f32.mrb[7].mxu0 }
 0x5ab   : > { %v2452_v33 = vld [vmem:[%s2787_s27] sm:$0xff]  }
 0x5ac   : > { %2317 = vmatpush3.bf16.msra.mxu0 %v2452_v33 }
 0x5ad   : > { %2318 = vmatprep.subr.bf16.mxu0 %v2592_v17 }
 0x5af   : > { %v917_v34 = vpop.f32.mrb[8].mxu0 }
 0x5b0   : > { %1596 = vrot.lane.b32.xlu0 %v917_v34, %s2618_s0  ;;  %v2234_v35 = vpop.f32.mrb[9].mxu0  ;;  %v2453_v34 = vld [vmem:[%s2787_s27 + $0x8] sm:$0xff]  }
 0x5b1   : > { %v920_v36 = vpop.f32.mrb[10].mxu0  ;;  %2319 = vmatpush3.bf16.msra.mxu0 %v2453_v34  ;;  %v2454_v35 = vld [vmem:[%s2793_s22] sm:$0xff]  }
 0x5b2   : > { %v2235_v37 = vpop.f32.mrb[11].mxu0 }
 0x5b7   : > { %v1029_v38 = vpop.f32.mrb[12].mxu0 }
 0x5b8   : > { %1600 = vrot.lane.b32.xlu0 %v1029_v38, %s2619_s18  ;;  %v2246_v39 = vpop.f32.mrb[13].mxu0 }
 0x5b9   : > { %v1032_v40 = vpop.f32.mrb[14].mxu0  ;;  %v1716_v39 = vsub.s32 4, %v2839_v21 }
 0x5ba   : > { %v2247_v41 = vpop.f32.mrb[15].mxu0  ;;  %v1721_v40 = vsub.s32 5, %v2839_v21 }
 0x5bb   : > { %v1717_v41 = vrot.slane %v2837_v20, %v1716_v39 }
 0x5bf   : > { %v1141_v42 = vpop.f32.mrb[16].mxu0 }
 0x5c0   : > { %1604 = vrot.lane.b32.xlu0 %v1141_v42, %s2620_s24  ;;  %v2258_v43 = vpop.f32.mrb[17].mxu0 }
 0x5c1   : > { %v1144_v44 = vpop.f32.mrb[18].mxu0 }
 0x5c2   : > { %v2259_v45 = vpop.f32.mrb[19].mxu0  ;;  %v1722_v44 = vrot.slane %v2837_v20, %v1721_v40 }
 0x5c7   : > { %v1253_v46 = vpop.f32.mrb[20].mxu0 }
 0x5c8   : > { %1608 = vrot.lane.b32.xlu0 %v1253_v46, %s2621_s23  ;;  %v2270_v47 = vpop.f32.mrb[21].mxu0 }
 0x5c9   : > { %v1256_v48 = vpop.f32.mrb[22].mxu0 }
 0x5ca   : > { %v2271_v49 = vpop.f32.mrb[23].mxu0  ;;  %v2456_v48 = vld [vmem:[%s2793_s22 + $0x10] sm:$0xff]  }
 0x5cb   : > { %v2457_v49 = vld [vmem:[%s2793_s22 + $0x18] sm:$0xff]  }
 0x622   : > { %v1597_v2 = vpop.permute.xlu0 %1596 }
 0x623   : > { %v1623_v5 = vsel %vm692_vm5, %v804_v30, %v1597_v2 }
 0x62a   : > { %v1601_v3 = vpop.permute.xlu0 %1600 }
 0x62b   : > { %v1624_v6 = vsel %vm747_vm6, %v1623_v5, %v1601_v3 }
 0x632   : > { %v1605_v4 = vpop.permute.xlu0 %1604 }
 0x633   : > { %v1626_v10 = vsel %vm1625_vm8, %v1624_v6, %v1605_v4 }
 0x635   : > { %v1365_v51 = vpop.f32.mrb[24].mxu0 }
 0x636   : > { %1612 = vrot.lane.b32.xlu1 %v1365_v51, %s2622_s15  ;;  %v2282_v52 = vpop.f32.mrb[25].mxu0 }
 0x637   : > { %v1368_v53 = vpop.f32.mrb[26].mxu0 }
 0x638   : > { %v2283_v54 = vpop.f32.mrb[27].mxu0 }
 0x63a   : > { %v1609_v28 = vpop.permute.xlu0 %1608 }
 0x63b   : > { %v1628_v11 = vsel %vm1627_vm9, %v1626_v10, %v1609_v28 }
 0x63d   : > { %v1477_v56 = vpop.f32.mrb[28].mxu0 }
 0x63e   : > { %1616 = vrot.lane.b32.xlu0 %v1477_v56, %s2623_s12  ;;  %v2294_v57 = vpop.f32.mrb[29].mxu0 }
 0x63f   : > { %v1480_v58 = vpop.f32.mrb[30].mxu0 }
 0x640   : > { %v2295_v59 = vpop.f32.mrb[31].mxu0  ;;  %v1803_v58 = vsub.s32 6, %v2839_v21 }
 0x645   : > { %v1589_v61 = vpop.f32.mrb[32].mxu0 }
 0x646   : > { %1620 = vrot.lane.b32.xlu1 %v1589_v61, %s2624_s13  ;;  %v2306_v62 = vpop.f32.mrb[33].mxu0 }
 0x647   : > { %v1592_v63 = vpop.f32.mrb[34].mxu0 }
 0x648   : > { %v2307_v60 = vpop.f32.mrb[35].mxu0 }
 0x6a8   : > { %v1613_v9 = vpop.permute.xlu1 %1612 }
 0x6a9   : > { %v1630_v12 = vsel %vm1629_vm10, %v1628_v11, %v1613_v9 }
 0x6b0   : > { %v1617_v0 = vpop.permute.xlu0 %1616 }
 0x6b1   : > { %v1632_v13 = vsel %vm1631_vm11, %v1630_v12, %v1617_v0  ;;  %v1889_v12 = vsub.s32 7, %v2839_v21 }
 0x6b8   : > { %v1621_v1 = vpop.permute.xlu1 %1620 }
 0x6b9   : > { %v1634_v8 = vsel %vm1633_vm12, %v1632_v13, %v1621_v1  ;;  %v1890_v13 = vrot.slane %v2837_v20, %v1889_v12 }
 0x6ba   : > { %v1635_v14 = vpack.c.bf16 %v1634_v8, %v1634_v8 }
 0x6bc   : > { %2313 = vmatmul.mubr.msk.bf16.vlgmr.msra.gmra.mrb[32].mxu1 %vm618_vm4, %v1635_v14  ;;  %v2124_v14 = vld [vmem:[%s2798_s29 + $0x8] ss:$0 sm:$0xff] }
 0x6bd   : > { %2332 = vmatprep.mubr.msk.bf16.mxu1 %vm2593_vm3, %v2592_v17  ;;  %2325 = vmatpush3.bf16.msra.mxu1 %v2454_v35 }
 0x6be   : > { %2326 = vmatprep.subr.bf16.mxu1 %v2592_v17 }
 0x78f   : > { %v1693_v15 = vpop.f32.mrb[32].mxu1 }
 0x790   : > { %v1694_v18 = vadd.f32 %v1693_v15, %v1643_v16  ;;  %v2314_v22 = vpop.f32.mrb[33].mxu1 }
 0x791   : > { %v1696_v23 = vpop.f32.mrb[34].mxu1 }
 0x792   : > { %v2315_v24 = vpop.f32.mrb[35].mxu1  ;;  %v1699_v25 = vadd.f32 %v1694_v18, %v2834_v19  ;;  %v2455_v19 = vld [vmem:[%s2793_s22 + $0x8] sm:$0xff]  }
 0x793   : > { %2327 = vmatpush3.bf16.msra.mxu1 %v2455_v19 }
 0x794   : > { %v1700_v26 = vsel %vm618_vm4, %v1699_v25, 0.0  ;;  %2328 = vmatprep.subr.bf16.mxu1 %v2592_v17 }
 0x795   : > { %1701 = vadd.xlane.f32.xlu0 %v1700_v26 }
 0x797   : > { %2329 = vmatpush3.bf16.msra.mxu1 %v2456_v48 }
 0x798   : > { %2330 = vmatprep.subr.bf16.mxu1 %v2592_v17  ;;  %v1804_v17 = vrot.slane %v2837_v20, %v1803_v58 }
 0x79b   : > { %2331 = vmatpush3.bf16.msra.mxu1 %v2457_v49 }
 0x822   : > { %v1702_v27 = vpop.xlane.xlu0 %1701 }
 0x823   : > { %v1704_v29 = vmul.f32 0.03125, %v1702_v27 }
 0x825   : > { %v1705_v30 = vsub.f32 %v1699_v25, %v1704_v29 }
 0x827   : > { %v1706_v31 = vmul.f32 %v1705_v30, %v1705_v30 }
 0x829   : > { %v1707_v32 = vsel %vm618_vm4, %v1706_v31, 0.0 }
 0x82a   : > { %1708 = vadd.xlane.f32.xlu1 %v1707_v32 }
 0x8b7   : > { %v1709_v36 = vpop.xlane.xlu1 %1708 }
 0x8b8   : > { %v1710_v37 = vmul.f32 0.03125, %v1709_v36 }
 0x8ba   : > { %v1711_v38 = vadd.f32 1e-05, %v1710_v37 }
 0x8bc   : > { %2490 = vrsqrt.f32 %v1711_v38 }
 0x8c6   : > { %v2491_v42 = vpop.eup %2490 }
 0x8c7   : > { %v1713_v43 = vmul.f32 %v2491_v42, %v1705_v30 }
 0x8c9   : > { %v1718_v45 = vmul.f32 %v1717_v41, %v1713_v43 }
 0x8cb   : > { %v1723_v46 = vadd.f32 %v1722_v44, %v1718_v45 }
 0x8cd   : > { %v1724_v47 = vpack.c.bf16 %v1723_v46, %v1723_v46 }
 0x8cf   : > { %2321 = vmatmul.mubr.msk.bf16.vlgmr.msra.gmra.mrb[36].mxu0 %vm618_vm4, %v1724_v47 }
 0x9a2   : > { %v1785_v51 = vpop.f32.mrb[36].mxu0 }
 0x9a3   : > { %v1786_v52 = vadd.f32 %v2115_v50, %v1785_v51  ;;  %v2322_v53 = vpop.f32.mrb[37].mxu0 }
 0x9a4   : > { %v1788_v54 = vpop.f32.mrb[38].mxu0 }
 0x9a5   : > { %v1791_v55 = vmax.f32 %v1786_v52, 0.0  ;;  %v2323_v56 = vpop.f32.mrb[39].mxu0 }
 0x9a7   : > { %v1792_v57 = vpack.c.bf16 %v1791_v55, %v1791_v55 }
 0x9a9   : > { %2333 = vmatmul.mubr.msk.bf16.vlgmr.msra.gmra.mrb[36].mxu1 %vm1829_vm13, %v1792_v57 }
 0xa7c   : > { %v1867_v59 = vpop.f32.mrb[36].mxu1 }
 0xa7d   : > { %v1868_v61 = vadd.f32 %v1867_v59, %v1804_v17  ;;  %v2334_v62 = vpop.f32.mrb[37].mxu1 }
 0xa7e   : > { %v1870_v63 = vpop.f32.mrb[38].mxu1 }
 0xa7f   : > { %v2335_v60 = vpop.f32.mrb[39].mxu1  ;;  %v1873_v2 = vadd.f32 %v1868_v61, %v1723_v46 }
 0xa81   : > { %v1874_v3 = vsel %vm618_vm4, %v1873_v2, 0.0 }
 0xa82   : > { %1875 = vadd.xlane.f32.xlu0 %v1874_v3 }
 0xb0f   : > { %v1876_v4 = vpop.xlane.xlu0 %1875 }
 0xb10   : > { %v1877_v28 = vmul.f32 0.03125, %v1876_v4 }
 0xb12   : > { %v1878_v5 = vsub.f32 %v1873_v2, %v1877_v28 }
 0xb14   : > { %v1879_v6 = vmul.f32 %v1878_v5, %v1878_v5 }
 0xb16   : > { %v1880_v9 = vsel %vm618_vm4, %v1879_v6, 0.0 }
 0xb17   : > { %1881 = vadd.xlane.f32.xlu0 %v1880_v9 }
 0xba4   : > { %v1882_v10 = vpop.xlane.xlu0 %1881 }
 0xba5   : > { %v1883_v0 = vmul.f32 0.03125, %v1882_v10 }
 0xba7   : > { %v1884_v11 = vadd.f32 1e-05, %v1883_v0 }
 0xba9   : > { %2492 = vrsqrt.f32 %v1884_v11 }
 0xbb3   : > { %v2493_v1 = vpop.eup %2492 }
 0xbb4   : > { %v1886_v8 = vmul.f32 %v2493_v1, %v1878_v5  ;;  %1901 = sbr.rel (%p2125_p1) target bundleno = 3005 (0xbbd), region = 68 }
 0xbb6   : > { %v1891_v7 = vmul.f32 %v1890_v13, %v1886_v8 }
 0xbb8   : > { %v1896_v16 = vadd.f32 %v2124_v14, %v1891_v7 }
 0xbba   : > { %1897 = vst.msk [vmem:[#allocation2] sm:$0xff] %vm618_vm4, %v1896_v16  ;;  %v1902_v15 = vpack.c.bf16 (!%p2125_p1), %v1896_v16, %v1896_v16 }
 0xbbc   : > { %1904 = vst.msk [vmem:[%s459_s4] sm:$0xf] %vm1903_vm14, %v1902_v15 }
 0xbbd PF: > { %s3163_s21 = sld [smem:[#allocation7_spill]]  ;;  %s2127_s20 = sshll.u32 %s2576_s17, 6 }
 0xbbe   : > { %s3165_s25 = sld [smem:[#allocation19_spill]]  ;;  %s1919_s19 = sshll.u32 %s459_s4, 4  ;;  %s1920_s19 = int_to_ptr.vmem [resolvable:$true] %s1919_s19 }
 0xbbf   : > { %s2494_s30 = scalar_lea.vmem %s1920_s19, 64  ;;  %s2625_s0 = smov [#allocation3]  }
 0xbc0   : > { %p2495_p2 = scmp.ne.s32.totalorder %s1920_s19, %s2494_s30  ;;  %s2498_s18 = sshll.u32 %s2625_s0, 4  ;;  %s2499_s18 = int_to_ptr.vmem [resolvable:$false] %s2498_s18 }
 0xbc1   : > { %s2500_s24 = scalar_lea.vmem %s2499_s18, 128  ;;  %p2501_p6 = scmp.lt.s32.totalorder %s1920_s19, %s2499_s18 }
 0xbc2   : > { %p2496_p4 = pnand %p2495_p2, %p2730_p3  ;;  %p2502_p7 = scmp.lt.s32.totalorder %s2500_s24, %s2494_s30 }
 0xbc3   : > { %s3166_s16 = sand.u32 1, %s3163_s21  }
 0xbc4   : > { %s3069_s28 = scalar_lea.hbm %s3165_s25, %s2127_s20  ;;  %s1906_s26 = scalar_lea.sflag [#allocation4], %s3166_s16 }
 0xbc5   : > { %p2497_p5 = pneg %p2496_p4  ;;  %p2503_p8 = por %p2502_p7, %p2501_p6 }
 0xbc7   : > { %p2504_p10 = pnand %p2503_p8, %p2497_p5 }
 0xbc9   : > { %2507 = shalt.err (!%p2504_p10)
}
 0xbca   : > { %s2508_s4 = scalar_lea.hbm %s3069_s28, 64  ;;  %s2512_s23 = scalar_lea.hbm %s3165_s25, 128 }
 0xbcb   : > { %p2509_p11 = scmp.ne.s32.totalorder %s3069_s28, %s2508_s4  ;;  %p2513_p0 = scmp.lt.u32.totalorder %s3069_s28, %s3165_s25 }
 0xbcc   : > { %p2514_p1 = scmp.lt.u32.totalorder %s2512_s23, %s2508_s4  ;;  %p2516_p4 = scmp.lt.u32.totalorder %s2508_s4, %s3069_s28 }
 0xbcd   : > { %p2510_p12 = pnand %p2509_p11, %p2730_p3 }
 0xbce   : > { %p2515_p2 = por %p2514_p1, %p2513_p0 }
 0xbcf   : > { %p2511_p13 = pneg %p2510_p12 }
 0xbd0   : > { %p2517_p5 = por %p2516_p4, %p2515_p2 }
 0xbd2   : > { %p2518_p6 = pnand %p2517_p5, %p2511_p13 }
 0xbd4   : > { %2521 = shalt.err (!%p2518_p6)
}
 0xbd5   : > { %2336 = dma.vmem_to_hbm [thread:$0]  (%p2730_p3), %s1920_s19, 64, %s3069_s28, %s1906_s26  }
 0xbd6 PF: > { %s3167_s13 = sld [smem:[#allocation11_spill]]  ;;  %s3168_s10 = sld [smem:[#allocation6_spill]] }
 0xbdc   : > { %p2342_p7 = scmp.ge.s32.totalorder %s3167_s13, 2  ;;  %s1931_s21 = sand.u32 1, %s3168_s10  }
 0xbdd   : > { %s1932_s20 = scalar_lea.sflag [#allocation4], %s1931_s21 }
 0xbde   : > { %p2339_p8 = pnand %p2342_p7, %p2740_p9 }
 0xbe0   : > { %2555 = dma.done.wait (!%p2339_p8), %s1932_s20, 64  }
 0xbe1   : > { %2557 = vsyncadd (!%p2339_p8), %s1932_s20, 4294967232  ;;  %s23_s20 = sadd.s32 1, %s3167_s13   ;;  %s3170_s13 = sld [smem:[#allocation7_spill]] }
 0xbe2   : > { %p20_p10 = scmp.ge.s32.totalorder %s23_s20, 6   ;;  %s3171_s14 = sld [smem:[#allocation8_spill]] }
 0xbe3   : > { %s3172_s15 = sld [smem:[#allocation16_spill]]  ;;  %s3173_s16 = sld [smem:[#allocation9_spill]] }
 0xbe4   : > { %s3174_s17 = sld [smem:[#allocation10_spill]]  ;;  %s3175_s18 = sld [smem:[#allocation12_spill]] }
 0xbe5   : > { %s3176_s19 = sld [smem:[#allocation14_spill]]  ;;  %22 = sbr.rel (!%p20_p10) target bundleno = 9 (0x9), region = 124 }
 0xbec   :  { %1937 = vsyncpa [#allocation4], 1 }
 0xbed   :  { %1939 = vsyncpa [#allocation4 + $0x1], 1 }

</bundles_post_ra>
